<compile_context>
chip_gen: v7x
topology: tpu7x:2x2x1
jax: 0.10.0
libtpu: 0.0.40
codegen_flags: <defaults>
</compile_context>

<pallas_src>
import functools

import jax
import jax.numpy as jnp
import numpy as np
from jax.experimental import pallas as pl
from jax.experimental.pallas import tpu as pltpu


def _round_up(x, m):
    return (x + m - 1) // m * m


def attention_kernel(x_ref, w_ref, v_ref, out_ref, *, seq_len):
    # x_ref  : [Bp, Sp, E]  zero-padded encoder outputs
    # w_ref  : [E, D]       (= attn.weight.T)
    # v_ref  : [1, D]       (= v.weight)
    # out_ref: [Bp, Sp]     softmax over the valid part of the seq axis
    bp, sp, e = x_ref.shape
    d = w_ref.shape[1]

    # One big MXU matmul over the flattened (batch*seq) slab + EUP tanh.
    x2d = x_ref[...].reshape(bp * sp, e)                 # leading-dim collapse (free)
    energy = jnp.tanh(
        jnp.dot(x2d, w_ref[...], preferred_element_type=jnp.float32))  # [Bp*Sp, D]

    # score[b, s] = <energy[b, s, :], v> : tiny rank-1 contraction (VPU mul +
    # XLU lane reduce); result lands with seq on the lane axis for the softmax.
    energy3 = energy.reshape(bp, sp, d)                  # leading-dim split (free)
    scores = jnp.sum(energy3 * v_ref[...], axis=-1)      # [Bp, Sp]

    # Mask padded sequence lanes before the softmax.
    col = jax.lax.broadcasted_iota(jnp.int32, (bp, sp), 1)
    scores = jnp.where(col < seq_len, scores, jnp.float32(-1e30))

    # Numerically stable softmax over the (lane) seq axis.
    m = jnp.max(scores, axis=-1, keepdims=True)
    ex = jnp.exp(scores - m)
    denom = jnp.sum(ex, axis=-1, keepdims=True)
    out_ref[...] = (ex * pl.reciprocal(denom, approx=True)).astype(out_ref.dtype)


def attention_forward(enc_out, attn_weight, v_weight):
    """Pallas implementation of Attention.forward.

    enc_out:     [B, S, enc_size]
    attn_weight: [dec_size, enc_size]   (PyTorch nn.Linear weight layout)
    v_weight:    [1, dec_size]          (PyTorch nn.Linear weight layout)
    returns:     [B, S] attention weights (softmax over S)
    """
    b, s, e = enc_out.shape
    d = attn_weight.shape[0]
    bp = _round_up(b, 8)      # sublane tile
    sp = _round_up(s, 128)    # lane tile -> lane-dense output store

    x = enc_out.astype(jnp.float32)
    if (bp, sp) != (b, s):
        x = jnp.pad(x, ((0, bp - b), (0, sp - s), (0, 0)))
    w = jnp.transpose(attn_weight).astype(jnp.float32)   # [E, D]
    v = v_weight.astype(jnp.float32).reshape(1, d)       # [1, D]
    # TODO(synk): at production sizes, cast x/w/v to bf16 for the MXU on
    # v6e/v7x (keep preferred_element_type=float32) and tile S/B with a
    # "parallel" grid axis; at these toy sizes a single fused call is optimal.

    out = pl.pallas_call(
        functools.partial(attention_kernel, seq_len=s),
        out_shape=jax.ShapeDtypeStruct((bp, sp), jnp.float32),
        in_specs=[pl.BlockSpec(memory_space=pltpu.MemorySpace.VMEM)] * 3,
        out_specs=pl.BlockSpec(memory_space=pltpu.MemorySpace.VMEM),
    )(x, w, v)
    return out[:b, :s]


def reference_forward(enc_out, attn_weight, v_weight):
    """Pure-JAX reference with identical semantics to the PyTorch module."""
    x = enc_out.astype(jnp.float32)
    energy = jnp.tanh(jnp.einsum("bse,de->bsd", x,
                                 attn_weight.astype(jnp.float32)))
    scores = jnp.einsum("bsd,od->bso", energy,
                        v_weight.astype(jnp.float32))[..., 0]
    return jax.nn.softmax(scores, axis=1)


if __name__ == "__main__":
    # small shapes consistent with the module: batch=2, seq=8,
    # enc_size=48, dec_size=32
    B, S = 2, 8
    ENC, DEC = 48, 32

    key = jax.random.PRNGKey(0)
    k1, k2, k3 = jax.random.split(key, 3)
    enc_out = jax.random.normal(k1, (B, S, ENC), jnp.float32)
    attn_weight = 0.1 * jax.random.normal(k2, (DEC, ENC), jnp.float32)
    v_weight = 0.1 * jax.random.normal(k3, (1, DEC), jnp.float32)

    out = attention_forward(enc_out, attn_weight, v_weight)
    out = jax.block_until_ready(out)

    ref = reference_forward(enc_out, attn_weight, v_weight)
    np.testing.assert_allclose(np.asarray(out), np.asarray(ref),
                               rtol=2e-3, atol=2e-3)
    np.testing.assert_allclose(np.asarray(out).sum(axis=1), np.ones(B),
                               rtol=2e-3, atol=2e-3)

    print("KERNEL_OK")
</pallas_src>

<mosaic_0001>
module attributes {stable_mosaic.version = 11 : i64} {
  func.func @attention_kernel(%arg0: memref<8x128x48xf32, #tpu.memory_space<vmem>>, %arg1: memref<48x32xf32, #tpu.memory_space<vmem>>, %arg2: memref<1x32xf32, #tpu.memory_space<vmem>>, %arg3: memref<8x128xf32, #tpu.memory_space<vmem>>) attributes {dimension_semantics = [], scalar_prefetch = 0 : i64, scratch_operands = 0 : i64, tpu.core_type = #tpu.core_type<tc>} {
    %c0 = arith.constant 0 : index
    %c0_0 = arith.constant 0 : index
    %c0_1 = arith.constant 0 : index
    %0 = vector.load %arg0[%c0, %c0_0, %c0_1] : memref<8x128x48xf32, #tpu.memory_space<vmem>>, vector<8x128x48xf32>
    %1 = vector.shape_cast %0 : vector<8x128x48xf32> to vector<1024x48xf32>
    %c0_2 = arith.constant 0 : index
    %c0_3 = arith.constant 0 : index
    %2 = vector.load %arg1[%c0_2, %c0_3] : memref<48x32xf32, #tpu.memory_space<vmem>>, vector<48x32xf32>
    %cst = arith.constant dense<0.000000e+00> : vector<1024x32xf32>
    %3 = tpu.matmul %1, %2, %cst {dimension_numbers = #tpu.dot_dimension_numbers<[1], [0], [0], [1], [0, 0, 1, 1], [], []>} : vector<1024x48xf32>, vector<48x32xf32>, vector<1024x32xf32> -> vector<1024x32xf32>
    %4 = math.tanh %3 : vector<1024x32xf32>
    %5 = vector.shape_cast %4 : vector<1024x32xf32> to vector<8x128x32xf32>
    %c0_4 = arith.constant 0 : index
    %c0_5 = arith.constant 0 : index
    %6 = vector.load %arg2[%c0_4, %c0_5] : memref<1x32xf32, #tpu.memory_space<vmem>>, vector<1x32xf32>
    %7 = vector.shape_cast %6 : vector<1x32xf32> to vector<1x1x32xf32>
    %8 = vector.broadcast %7 : vector<1x1x32xf32> to vector<8x128x32xf32>
    %9 = arith.mulf %5, %8 : vector<8x128x32xf32>
    %cst_6 = arith.constant dense<0.000000e+00> : vector<8x128xf32>
    %10 = vector.multi_reduction <add>, %9, %cst_6 [2] : vector<8x128x32xf32> to vector<8x128xf32>
    %11 = tpu.iota {dimensions = array<i32: 1>} : vector<8x128xi32>
    %c8_i32 = arith.constant 8 : i32
    %12 = vector.broadcast %c8_i32 : i32 to vector<8x128xi32>
    %13 = arith.cmpi slt, %11, %12 : vector<8x128xi32>
    %cst_7 = arith.constant -1.000000e+30 : f32
    %14 = vector.broadcast %cst_7 : f32 to vector<8x128xf32>
    %15 = arith.select %13, %10, %14 : vector<8x128xi1>, vector<8x128xf32>
    %cst_8 = arith.constant dense<0xFF800000> : vector<8xf32>
    %16 = vector.multi_reduction <maximumf>, %15, %cst_8 [1] : vector<8x128xf32> to vector<8xf32>
    %17 = vector.shape_cast %16 : vector<8xf32> to vector<8x1xf32>
    %18 = vector.broadcast %17 : vector<8x1xf32> to vector<8x128xf32>
    %19 = arith.subf %15, %18 : vector<8x128xf32>
    %20 = math.exp %19 : vector<8x128xf32>
    %cst_9 = arith.constant dense<0.000000e+00> : vector<8xf32>
    %21 = vector.multi_reduction <add>, %20, %cst_9 [1] : vector<8x128xf32> to vector<8xf32>
    %22 = vector.shape_cast %21 : vector<8xf32> to vector<8x1xf32>
    %23 = tpu.reciprocal %22 {approx = true} : vector<8x1xf32> -> vector<8x1xf32>
    %24 = vector.broadcast %23 : vector<8x1xf32> to vector<8x128xf32>
    %25 = arith.mulf %20, %24 : vector<8x128xf32>
    %c0_10 = arith.constant 0 : index
    %c0_11 = arith.constant 0 : index
    %26 = vector.load %arg3[%c0_10, %c0_11] : memref<8x128xf32, #tpu.memory_space<vmem>>, vector<8x128xf32>
    tpu.vector_store %arg3[%c0_10, %c0_11], %25 {strides = array<i32>} : memref<8x128xf32, #tpu.memory_space<vmem>>, vector<8x128xf32>,
    return
  }
}

</mosaic_0001>

<bundles_post_ra>
// kernel: tpu_custom_call.1
= control target key start
LH: loop header
LB: loop body
LE: loop exit
PB: predicated region body
PF: predicated region fallthrough
CT: control target
= control target key end

     0   :  { %vm149_vm0 = vcmask 392192   ;;  %s5078_s0 = inlined_call_operand.vmem [shape: f32[8,128,48], index: 0, kind: input, shape index: {}]   ;;  %s5079_s1 = inlined_call_operand.vmem [shape: f32[48,32], index: 1, kind: input, shape index: {}]   ;;  %s5080_s2 = inlined_call_operand.vmem [shape: f32[1,32], index: 2, kind: input, shape index: {}]   ;;  %s5081_s3 = inlined_call_operand.hbm [shape: f32[8,128], index: 3, kind: output, shape index: {}]  }
   0x1   :  { %v143_v0 = vld [vmem:[%s5079_s1] sm:$0xff]  ;;  %v144_v1 = vld [vmem:[%s5079_s1 + $0x8] sm:$0xff]  ;;  %v145_v2 = vld [vmem:[%s5079_s1 + $0x10] sm:$0xff] }
   0x2   :  { %v3187_v3 = vpack.c.bf16 %v144_v1, %v143_v0  ;;  %v146_v4 = vld [vmem:[%s5079_s1 + $0x18] sm:$0xff]  ;;  %v147_v6 = vld [vmem:[%s5079_s1 + $0x20] sm:$0xff]  ;;  %v148_v7 = vld [vmem:[%s5079_s1 + $0x28] sm:$0xff] }
   0x3   :  { %v3191_v5 = vpack.c.bf16 %v146_v4, %v145_v2  ;;  %v15_v8 = vld [vmem:[%s5078_s0] sm:$0xff]  ;;  %v3195_v10 = vpack.c.bf16 %v148_v7, %v147_v6  ;;  %v16_v11 = vld [vmem:[%s5078_s0 + $0x8] sm:$0xff]  ;;  %v17_v13 = vld [vmem:[%s5078_s0 + $0x10] sm:$0xff] }
   0x4   :  { %3188 = vmatprep.subr.bf16.mxu0 %v3187_v3  ;;  %3199 = vmatprep.subr.bf16.mxu1 %v3187_v3  ;;  %v79_v9 = vld [vmem:[%s5078_s0 + $0x200] sm:$0xff]  ;;  %v80_v12 = vld [vmem:[%s5078_s0 + $0x208] sm:$0xff]  ;;  %v81_v14 = vld [vmem:[%s5078_s0 + $0x210] sm:$0xff] }
   0x5   :  { %3190 = vmatpush3.bf16.msra.mxu0 %v3187_v3  ;;  %3202 = vmatpush3.bf16.msra.mxu1 %v3187_v3  ;;  %v18_v15 = vld [vmem:[%s5078_s0 + $0x18] sm:$0xff]  ;;  %v19_v17 = vld [vmem:[%s5078_s0 + $0x20] sm:$0xff]  ;;  %v20_v19 = vld [vmem:[%s5078_s0 + $0x28] sm:$0xff] }
   0x6   :  { %3192 = vmatprep.subr.bf16.mxu0 %v3191_v5  ;;  %3200 = vmatprep.subr.bf16.mxu1 %v3191_v5  ;;  %v82_v16 = vld [vmem:[%s5078_s0 + $0x218] sm:$0xff]  ;;  %v83_v18 = vld [vmem:[%s5078_s0 + $0x220] sm:$0xff]  ;;  %v84_v20 = vld [vmem:[%s5078_s0 + $0x228] sm:$0xff] }
   0x7   :  { %2995 = vmatprep.mubr.msk.f32.mxu0 %vm149_vm0, %v15_v8  ;;  %3091 = vmatprep.mubr.msk.f32.mxu1 %vm149_vm0, %v79_v9  ;;  %v21_v21 = vld [vmem:[%s5078_s0 + $0x30] sm:$0xff]  ;;  %v22_v23 = vld [vmem:[%s5078_s0 + $0x38] sm:$0xff]  ;;  %v23_v25 = vld [vmem:[%s5078_s0 + $0x40] sm:$0xff] }
   0x8   :  { %v85_v22 = vld [vmem:[%s5078_s0 + $0x230] sm:$0xff]  ;;  %v86_v24 = vld [vmem:[%s5078_s0 + $0x238] sm:$0xff]  ;;  %v87_v26 = vld [vmem:[%s5078_s0 + $0x240] sm:$0xff] }
   0x9   :  { %3194 = vmatpush3.bf16.msra.mxu0 %v3191_v5  ;;  %3203 = vmatpush3.bf16.msra.mxu1 %v3191_v5  ;;  %v24_v27 = vld [vmem:[%s5078_s0 + $0x48] sm:$0xff]  ;;  %v25_v29 = vld [vmem:[%s5078_s0 + $0x50] sm:$0xff]  ;;  %v26_v31 = vld [vmem:[%s5078_s0 + $0x58] sm:$0xff] }
   0xa   :  { %3196 = vmatprep.subr.bf16.mxu0 %v3195_v10  ;;  %3201 = vmatprep.subr.bf16.mxu1 %v3195_v10  ;;  %v88_v28 = vld [vmem:[%s5078_s0 + $0x248] sm:$0xff]  ;;  %v89_v30 = vld [vmem:[%s5078_s0 + $0x250] sm:$0xff]  ;;  %v90_v32 = vld [vmem:[%s5078_s0 + $0x258] sm:$0xff] }
   0xb   :  { %v27_v33 = vld [vmem:[%s5078_s0 + $0x60] sm:$0xff]  ;;  %v28_v35 = vld [vmem:[%s5078_s0 + $0x68] sm:$0xff]  ;;  %v29_v37 = vld [vmem:[%s5078_s0 + $0x70] sm:$0xff] }
   0xc   :  { %v91_v34 = vld [vmem:[%s5078_s0 + $0x260] sm:$0xff]  ;;  %v92_v36 = vld [vmem:[%s5078_s0 + $0x268] sm:$0xff]  ;;  %v93_v38 = vld [vmem:[%s5078_s0 + $0x270] sm:$0xff] }
   0xd   :  { %3198 = vmatpush3.bf16.msra.mxu0 %v3195_v10  ;;  %3204 = vmatpush3.bf16.msra.mxu1 %v3195_v10  ;;  %v30_v39 = vld [vmem:[%s5078_s0 + $0x78] sm:$0xff] }
   0xe   :  { %v94_v40 = vld [vmem:[%s5078_s0 + $0x278] sm:$0xff] }
  0x10   :  { %2996 = vmatmul.mubr.msk.f32.vlgmr.msra.gmra.mrb[0].mxu0 %vm149_vm0, %v16_v11  ;;  %3092 = vmatmul.mubr.msk.f32.vlgmr.msra.gmra.mrb[0].mxu1 %vm149_vm0, %v80_v12 }
  0x11   :  { %2998 = vmatprep.mubr.msk.f32.mxu0 %vm149_vm0, %v17_v13  ;;  %3094 = vmatprep.mubr.msk.f32.mxu1 %vm149_vm0, %v81_v14 }
  0x14   :  { %2999 = vmatmul.mubr.msk.f32.gmra.mrb[2].mxu0 %vm149_vm0, %v18_v15  ;;  %3095 = vmatmul.mubr.msk.f32.gmra.mrb[2].mxu1 %vm149_vm0, %v82_v16 }
  0x15   :  { %3001 = vmatprep.mubr.msk.f32.mxu0 %vm149_vm0, %v19_v17  ;;  %3097 = vmatprep.mubr.msk.f32.mxu1 %vm149_vm0, %v83_v18 }
  0x18   :  { %3002 = vmatmul.mubr.msk.f32.gmra.mrb[4].mxu0 %vm149_vm0, %v20_v19  ;;  %3098 = vmatmul.mubr.msk.f32.gmra.mrb[4].mxu1 %vm149_vm0, %v84_v20 }
  0x19   :  { %3004 = vmatprep.mubr.msk.f32.mxu0 %vm149_vm0, %v21_v21  ;;  %3100 = vmatprep.mubr.msk.f32.mxu1 %vm149_vm0, %v85_v22 }
  0x1c   :  { %3005 = vmatmul.mubr.msk.f32.gmra.mrb[6].mxu0 %vm149_vm0, %v22_v23  ;;  %3101 = vmatmul.mubr.msk.f32.gmra.mrb[6].mxu1 %vm149_vm0, %v86_v24 }
  0x1d   :  { %3007 = vmatprep.mubr.msk.f32.mxu0 %vm149_vm0, %v23_v25  ;;  %3103 = vmatprep.mubr.msk.f32.mxu1 %vm149_vm0, %v87_v26 }
  0x20   :  { %3008 = vmatmul.mubr.msk.f32.gmra.mrb[8].mxu0 %vm149_vm0, %v24_v27  ;;  %3104 = vmatmul.mubr.msk.f32.gmra.mrb[8].mxu1 %vm149_vm0, %v88_v28 }
  0x21   :  { %3010 = vmatprep.mubr.msk.f32.mxu0 %vm149_vm0, %v25_v29  ;;  %3106 = vmatprep.mubr.msk.f32.mxu1 %vm149_vm0, %v89_v30 }
  0x24   :  { %3011 = vmatmul.mubr.msk.f32.gmra.mrb[10].mxu0 %vm149_vm0, %v26_v31  ;;  %3107 = vmatmul.mubr.msk.f32.gmra.mrb[10].mxu1 %vm149_vm0, %v90_v32 }
  0x25   :  { %3013 = vmatprep.mubr.msk.f32.mxu0 %vm149_vm0, %v27_v33  ;;  %3109 = vmatprep.mubr.msk.f32.mxu1 %vm149_vm0, %v91_v34 }
  0x28   :  { %3014 = vmatmul.mubr.msk.f32.gmra.mrb[12].mxu0 %vm149_vm0, %v28_v35  ;;  %3110 = vmatmul.mubr.msk.f32.gmra.mrb[12].mxu1 %vm149_vm0, %v92_v36 }
  0x29   :  { %3016 = vmatprep.mubr.msk.f32.mxu0 %vm149_vm0, %v29_v37  ;;  %3112 = vmatprep.mubr.msk.f32.mxu1 %vm149_vm0, %v93_v38 }
  0x2a   :  { %8 = vsyncpa [#allocation3], 0  ;;  %v31_v41 = vld [vmem:[%s5078_s0 + $0x80] sm:$0xff]  ;;  %v32_v43 = vld [vmem:[%s5078_s0 + $0x88] sm:$0xff]  ;;  %vm1502_vm1 = vcmask 261120   ;;  %vm2027_vm2 = vcmask 130112  }
  0x2b   :  { %v95_v42 = vld [vmem:[%s5078_s0 + $0x280] sm:$0xff]  ;;  %v96_v44 = vld [vmem:[%s5078_s0 + $0x288] sm:$0xff]  ;;  %v33_v45 = vld [vmem:[%s5078_s0 + $0x90] sm:$0xff]  ;;  %vm2034_vm3 = vcmask 195712   ;;  %vm2041_vm4 = vcmask 261312   ;;  %vm2048_vm5 = vcmask 326912  }
  0x2c   :  { %3017 = vmatmul.mubr.msk.f32.gmra.mrb[14].mxu0 %vm149_vm0, %v30_v39  ;;  %3113 = vmatmul.mubr.msk.f32.gmra.mrb[14].mxu1 %vm149_vm0, %v94_v40  ;;  %v97_v46 = vld [vmem:[%s5078_s0 + $0x290] sm:$0xff]  ;;  %v34_v47 = vld [vmem:[%s5078_s0 + $0x98] sm:$0xff]  ;;  %v35_v49 = vld [vmem:[%s5078_s0 + $0xa0] sm:$0xff]  ;;  %vm2055_vm6 = vcmask 392512   ;;  %vm2062_vm7 = vcmask 458112   ;;  %vm2069_vm8 = vcmask 523712  }
  0x2d   :  { %3019 = vmatprep.mubr.msk.f32.mxu0 %vm149_vm0, %v31_v41  ;;  %3115 = vmatprep.mubr.msk.f32.mxu1 %vm149_vm0, %v95_v42  ;;  %v98_v48 = vld [vmem:[%s5078_s0 + $0x298] sm:$0xff]  ;;  %v99_v50 = vld [vmem:[%s5078_s0 + $0x2a0] sm:$0xff]  ;;  %v36_v51 = vld [vmem:[%s5078_s0 + $0xa8] sm:$0xff]  ;;  %vm2076_vm9 = vcmask 589312   ;;  %vm2083_vm10 = vcmask 654912   ;;  %vm2090_vm11 = vcmask 720512  }
  0x2e   :  { %v100_v52 = vld [vmem:[%s5078_s0 + $0x2a8] sm:$0xff]  ;;  %v101_v53 = vld [vmem:[%s5078_s0 + $0x2b0] sm:$0xff]  ;;  %v102_v55 = vld [vmem:[%s5078_s0 + $0x2b8] sm:$0xff]  ;;  %vm2097_vm12 = vcmask 786112   ;;  %vm2104_vm13 = vcmask 851712   ;;  %vm2111_vm14 = vcmask 917312  }
  0x2f   :  { %v37_v54 = vld [vmem:[%s5078_s0 + $0xb0] sm:$0xff]  ;;  %v38_v56 = vld [vmem:[%s5078_s0 + $0xb8] sm:$0xff]  ;;  %v39_v57 = vld [vmem:[%s5078_s0 + $0xc0] sm:$0xff]  ;;  %vm2118_vm15 = vcmask 982912  }
  0x30   :  { %3020 = vmatmul.mubr.msk.f32.gmra.mrb[16].mxu0 %vm149_vm0, %v32_v43  ;;  %3116 = vmatmul.mubr.msk.f32.gmra.mrb[16].mxu1 %vm149_vm0, %v96_v44  ;;  %v103_v58 = vld [vmem:[%s5078_s0 + $0x2c0] sm:$0xff]  ;;  %v40_v59 = vld [vmem:[%s5078_s0 + $0xc8] sm:$0xff]  ;;  %v41_v61 = vld [vmem:[%s5078_s0 + $0xd0] sm:$0xff] }
  0x31   :  { %3022 = vmatprep.mubr.msk.f32.mxu0 %vm149_vm0, %v33_v45  ;;  %3118 = vmatprep.mubr.msk.f32.mxu1 %vm149_vm0, %v97_v46  ;;  %v104_v60 = vld [vmem:[%s5078_s0 + $0x2c8] sm:$0xff]  ;;  %v105_v62 = vld [vmem:[%s5078_s0 + $0x2d0] sm:$0xff]  ;;  %v42_v63 = vld [vmem:[%s5078_s0 + $0xd8] sm:$0xff] }
  0x32   :  { %v106_v0 = vld [vmem:[%s5078_s0 + $0x2d8] sm:$0xff]  ;;  %v43_v1 = vld [vmem:[%s5078_s0 + $0xe0] sm:$0xff]  ;;  %v44_v3 = vld [vmem:[%s5078_s0 + $0xe8] sm:$0xff] }
  0x33   :  { %v107_v2 = vld [vmem:[%s5078_s0 + $0x2e0] sm:$0xff]  ;;  %v108_v4 = vld [vmem:[%s5078_s0 + $0x2e8] sm:$0xff]  ;;  %v45_v5 = vld [vmem:[%s5078_s0 + $0xf0] sm:$0xff] }
  0x34   :  { %3023 = vmatmul.mubr.msk.f32.gmra.mrb[18].mxu0 %vm149_vm0, %v34_v47  ;;  %3119 = vmatmul.mubr.msk.f32.gmra.mrb[18].mxu1 %vm149_vm0, %v98_v48  ;;  %v109_v6 = vld [vmem:[%s5078_s0 + $0x2f0] sm:$0xff]  ;;  %v46_v7 = vld [vmem:[%s5078_s0 + $0xf8] sm:$0xff]  ;;  %v47_v9 = vld [vmem:[%s5078_s0 + $0x100] sm:$0xff] }
  0x35   :  { %3025 = vmatprep.mubr.msk.f32.mxu0 %vm149_vm0, %v35_v49  ;;  %3121 = vmatprep.mubr.msk.f32.mxu1 %vm149_vm0, %v99_v50  ;;  %v110_v8 = vld [vmem:[%s5078_s0 + $0x2f8] sm:$0xff]  ;;  %v111_v10 = vld [vmem:[%s5078_s0 + $0x300] sm:$0xff]  ;;  %v48_v11 = vld [vmem:[%s5078_s0 + $0x108] sm:$0xff] }
  0x36   :  { %v112_v12 = vld [vmem:[%s5078_s0 + $0x308] sm:$0xff]  ;;  %v49_v13 = vld [vmem:[%s5078_s0 + $0x110] sm:$0xff]  ;;  %v50_v15 = vld [vmem:[%s5078_s0 + $0x118] sm:$0xff] }
  0x37   :  { %v113_v14 = vld [vmem:[%s5078_s0 + $0x310] sm:$0xff]  ;;  %v114_v16 = vld [vmem:[%s5078_s0 + $0x318] sm:$0xff]  ;;  %v51_v17 = vld [vmem:[%s5078_s0 + $0x120] sm:$0xff] }
  0x38   :  { %3026 = vmatmul.mubr.msk.f32.gmra.mrb[20].mxu0 %vm149_vm0, %v36_v51  ;;  %3122 = vmatmul.mubr.msk.f32.gmra.mrb[20].mxu1 %vm149_vm0, %v100_v52  ;;  %v115_v18 = vld [vmem:[%s5078_s0 + $0x320] sm:$0xff]  ;;  %v52_v19 = vld [vmem:[%s5078_s0 + $0x128] sm:$0xff]  ;;  %v53_v21 = vld [vmem:[%s5078_s0 + $0x130] sm:$0xff] }
  0x39   :  { %3124 = vmatprep.mubr.msk.f32.mxu1 %vm149_vm0, %v101_v53  ;;  %3028 = vmatprep.mubr.msk.f32.mxu0 %vm149_vm0, %v37_v54  ;;  %v116_v20 = vld [vmem:[%s5078_s0 + $0x328] sm:$0xff]  ;;  %v117_v22 = vld [vmem:[%s5078_s0 + $0x330] sm:$0xff]  ;;  %v54_v23 = vld [vmem:[%s5078_s0 + $0x138] sm:$0xff] }
  0x3a   :  { %v118_v24 = vld [vmem:[%s5078_s0 + $0x338] sm:$0xff]  ;;  %v55_v25 = vld [vmem:[%s5078_s0 + $0x140] sm:$0xff]  ;;  %v56_v27 = vld [vmem:[%s5078_s0 + $0x148] sm:$0xff] }
  0x3b   :  { %v119_v26 = vld [vmem:[%s5078_s0 + $0x340] sm:$0xff]  ;;  %v120_v28 = vld [vmem:[%s5078_s0 + $0x348] sm:$0xff]  ;;  %v57_v29 = vld [vmem:[%s5078_s0 + $0x150] sm:$0xff] }
  0x3c   :  { %3125 = vmatmul.mubr.msk.f32.gmra.mrb[22].mxu1 %vm149_vm0, %v102_v55  ;;  %3029 = vmatmul.mubr.msk.f32.gmra.mrb[22].mxu0 %vm149_vm0, %v38_v56  ;;  %v121_v30 = vld [vmem:[%s5078_s0 + $0x350] sm:$0xff]  ;;  %v58_v31 = vld [vmem:[%s5078_s0 + $0x158] sm:$0xff]  ;;  %v59_v33 = vld [vmem:[%s5078_s0 + $0x160] sm:$0xff] }
  0x3d   :  { %3031 = vmatprep.mubr.msk.f32.mxu0 %vm149_vm0, %v39_v57  ;;  %3127 = vmatprep.mubr.msk.f32.mxu1 %vm149_vm0, %v103_v58  ;;  %v122_v32 = vld [vmem:[%s5078_s0 + $0x358] sm:$0xff]  ;;  %v123_v34 = vld [vmem:[%s5078_s0 + $0x360] sm:$0xff]  ;;  %v60_v35 = vld [vmem:[%s5078_s0 + $0x168] sm:$0xff] }
  0x3e   :  { %v124_v36 = vld [vmem:[%s5078_s0 + $0x368] sm:$0xff]  ;;  %v61_v37 = vld [vmem:[%s5078_s0 + $0x170] sm:$0xff]  ;;  %v62_v39 = vld [vmem:[%s5078_s0 + $0x178] sm:$0xff] }
  0x3f   :  { %v125_v38 = vld [vmem:[%s5078_s0 + $0x370] sm:$0xff]  ;;  %v126_v40 = vld [vmem:[%s5078_s0 + $0x378] sm:$0xff]  ;;  %v63_v41 = vld [vmem:[%s5078_s0 + $0x180] sm:$0xff] }
  0x40   :  { %3032 = vmatmul.mubr.msk.f32.gmra.mrb[24].mxu0 %vm149_vm0, %v40_v59  ;;  %3128 = vmatmul.mubr.msk.f32.gmra.mrb[24].mxu1 %vm149_vm0, %v104_v60  ;;  %v127_v42 = vld [vmem:[%s5078_s0 + $0x380] sm:$0xff]  ;;  %v64_v43 = vld [vmem:[%s5078_s0 + $0x188] sm:$0xff]  ;;  %v65_v45 = vld [vmem:[%s5078_s0 + $0x190] sm:$0xff] }
  0x41   :  { %3034 = vmatprep.mubr.msk.f32.mxu0 %vm149_vm0, %v41_v61  ;;  %3130 = vmatprep.mubr.msk.f32.mxu1 %vm149_vm0, %v105_v62  ;;  %v128_v44 = vld [vmem:[%s5078_s0 + $0x388] sm:$0xff]  ;;  %v129_v46 = vld [vmem:[%s5078_s0 + $0x390] sm:$0xff]  ;;  %v66_v47 = vld [vmem:[%s5078_s0 + $0x198] sm:$0xff] }
  0x42   :  { %v130_v48 = vld [vmem:[%s5078_s0 + $0x398] sm:$0xff]  ;;  %v131_v49 = vld [vmem:[%s5078_s0 + $0x3a0] sm:$0xff]  ;;  %v132_v51 = vld [vmem:[%s5078_s0 + $0x3a8] sm:$0xff] }
  0x43   :  { %v67_v50 = vld [vmem:[%s5078_s0 + $0x1a0] sm:$0xff]  ;;  %v68_v52 = vld [vmem:[%s5078_s0 + $0x1a8] sm:$0xff]  ;;  %v69_v53 = vld [vmem:[%s5078_s0 + $0x1b0] sm:$0xff] }
  0x44   :  { %3035 = vmatmul.mubr.msk.f32.gmra.mrb[26].mxu0 %vm149_vm0, %v42_v63  ;;  %3131 = vmatmul.mubr.msk.f32.gmra.mrb[26].mxu1 %vm149_vm0, %v106_v0  ;;  %v133_v54 = vld [vmem:[%s5078_s0 + $0x3b0] sm:$0xff]  ;;  %v70_v55 = vld [vmem:[%s5078_s0 + $0x1b8] sm:$0xff]  ;;  %v71_v57 = vld [vmem:[%s5078_s0 + $0x1c0] sm:$0xff] }
  0x45   :  { %3037 = vmatprep.mubr.msk.f32.mxu0 %vm149_vm0, %v43_v1  ;;  %3133 = vmatprep.mubr.msk.f32.mxu1 %vm149_vm0, %v107_v2  ;;  %v134_v56 = vld [vmem:[%s5078_s0 + $0x3b8] sm:$0xff]  ;;  %v135_v58 = vld [vmem:[%s5078_s0 + $0x3c0] sm:$0xff]  ;;  %v72_v59 = vld [vmem:[%s5078_s0 + $0x1c8] sm:$0xff] }
  0x46   :  { %v136_v60 = vld [vmem:[%s5078_s0 + $0x3c8] sm:$0xff]  ;;  %v73_v61 = vld [vmem:[%s5078_s0 + $0x1d0] sm:$0xff]  ;;  %v74_v63 = vld [vmem:[%s5078_s0 + $0x1d8] sm:$0xff] }
  0x47   :  { %v137_v62 = vld [vmem:[%s5078_s0 + $0x3d0] sm:$0xff]  ;;  %v138_v0 = vld [vmem:[%s5078_s0 + $0x3d8] sm:$0xff]  ;;  %v75_v1 = vld [vmem:[%s5078_s0 + $0x1e0] sm:$0xff] }
  0x48   :  { %3038 = vmatmul.mubr.msk.f32.gmra.mrb[28].mxu0 %vm149_vm0, %v44_v3  ;;  %3134 = vmatmul.mubr.msk.f32.gmra.mrb[28].mxu1 %vm149_vm0, %v108_v4  ;;  %v139_v2 = vld [vmem:[%s5078_s0 + $0x3e0] sm:$0xff]  ;;  %v76_v3 = vld [vmem:[%s5078_s0 + $0x1e8] sm:$0xff] }
  0x49   :  { %3040 = vmatprep.mubr.msk.f32.mxu0 %vm149_vm0, %v45_v5  ;;  %3136 = vmatprep.mubr.msk.f32.mxu1 %vm149_vm0, %v109_v6  ;;  %v140_v4 = vld [vmem:[%s5078_s0 + $0x3e8] sm:$0xff]  ;;  %v77_v5 = vld [vmem:[%s5078_s0 + $0x1f0] sm:$0xff]  ;;  %v78_v6 = vld [vmem:[%s5078_s0 + $0x1f8] sm:$0xff] }
  0x4c   :  { %3041 = vmatmul.mubr.msk.f32.gmra.mrb[30].mxu0 %vm149_vm0, %v46_v7  ;;  %3137 = vmatmul.mubr.msk.f32.gmra.mrb[30].mxu1 %vm149_vm0, %v110_v8  ;;  %v141_v7 = vld [vmem:[%s5078_s0 + $0x3f0] sm:$0xff]  ;;  %v142_v8 = vld [vmem:[%s5078_s0 + $0x3f8] sm:$0xff] }
  0x4d   :  { %3043 = vmatprep.mubr.msk.f32.mxu0 %vm149_vm0, %v47_v9  ;;  %3139 = vmatprep.mubr.msk.f32.mxu1 %vm149_vm0, %v111_v10 }
  0x50   :  { %3044 = vmatmul.mubr.msk.f32.gmra.mrb[32].mxu0 %vm149_vm0, %v48_v11  ;;  %3140 = vmatmul.mubr.msk.f32.gmra.mrb[32].mxu1 %vm149_vm0, %v112_v12 }
  0x51   :  { %3046 = vmatprep.mubr.msk.f32.mxu0 %vm149_vm0, %v49_v13  ;;  %3142 = vmatprep.mubr.msk.f32.mxu1 %vm149_vm0, %v113_v14 }
  0x54   :  { %3047 = vmatmul.mubr.msk.f32.gmra.mrb[34].mxu0 %vm149_vm0, %v50_v15  ;;  %3143 = vmatmul.mubr.msk.f32.gmra.mrb[34].mxu1 %vm149_vm0, %v114_v16 }
  0x55   :  { %3049 = vmatprep.mubr.msk.f32.mxu0 %vm149_vm0, %v51_v17  ;;  %3145 = vmatprep.mubr.msk.f32.mxu1 %vm149_vm0, %v115_v18 }
  0x58   :  { %3050 = vmatmul.mubr.msk.f32.gmra.mrb[36].mxu0 %vm149_vm0, %v52_v19  ;;  %3146 = vmatmul.mubr.msk.f32.gmra.mrb[36].mxu1 %vm149_vm0, %v116_v20 }
  0x59   :  { %3052 = vmatprep.mubr.msk.f32.mxu0 %vm149_vm0, %v53_v21  ;;  %3148 = vmatprep.mubr.msk.f32.mxu1 %vm149_vm0, %v117_v22  ;;  %v4045_v21 = vld [vmem:[%s5080_s2] ss:$0 sm:$0xff] }
  0x5c   :  { %3053 = vmatmul.mubr.msk.f32.gmra.mrb[38].mxu0 %vm149_vm0, %v54_v23  ;;  %3149 = vmatmul.mubr.msk.f32.gmra.mrb[38].mxu1 %vm149_vm0, %v118_v24 }
  0x5d   :  { %3055 = vmatprep.mubr.msk.f32.mxu0 %vm149_vm0, %v55_v25  ;;  %3151 = vmatprep.mubr.msk.f32.mxu1 %vm149_vm0, %v119_v26 }
  0x60   :  { %3056 = vmatmul.mubr.msk.f32.gmra.mrb[40].mxu0 %vm149_vm0, %v56_v27  ;;  %3152 = vmatmul.mubr.msk.f32.gmra.mrb[40].mxu1 %vm149_vm0, %v120_v28 }
  0x61   :  { %3058 = vmatprep.mubr.msk.f32.mxu0 %vm149_vm0, %v57_v29  ;;  %3154 = vmatprep.mubr.msk.f32.mxu1 %vm149_vm0, %v121_v30 }
  0x64   :  { %3059 = vmatmul.mubr.msk.f32.gmra.mrb[42].mxu0 %vm149_vm0, %v58_v31  ;;  %3155 = vmatmul.mubr.msk.f32.gmra.mrb[42].mxu1 %vm149_vm0, %v122_v32 }
  0x65   :  { %3061 = vmatprep.mubr.msk.f32.mxu0 %vm149_vm0, %v59_v33  ;;  %3157 = vmatprep.mubr.msk.f32.mxu1 %vm149_vm0, %v123_v34 }
  0x68   :  { %3062 = vmatmul.mubr.msk.f32.gmra.mrb[44].mxu0 %vm149_vm0, %v60_v35  ;;  %3158 = vmatmul.mubr.msk.f32.gmra.mrb[44].mxu1 %vm149_vm0, %v124_v36 }
  0x69   :  { %3064 = vmatprep.mubr.msk.f32.mxu0 %vm149_vm0, %v61_v37  ;;  %3160 = vmatprep.mubr.msk.f32.mxu1 %vm149_vm0, %v125_v38 }
  0x6c   :  { %3065 = vmatmul.mubr.msk.f32.gmra.mrb[46].mxu0 %vm149_vm0, %v62_v39  ;;  %3161 = vmatmul.mubr.msk.f32.gmra.mrb[46].mxu1 %vm149_vm0, %v126_v40 }
  0x6d   :  { %3067 = vmatprep.mubr.msk.f32.mxu0 %vm149_vm0, %v63_v41  ;;  %3163 = vmatprep.mubr.msk.f32.mxu1 %vm149_vm0, %v127_v42 }
  0x70   :  { %3068 = vmatmul.mubr.msk.f32.gmra.mrb[48].mxu0 %vm149_vm0, %v64_v43  ;;  %3164 = vmatmul.mubr.msk.f32.gmra.mrb[48].mxu1 %vm149_vm0, %v128_v44 }
  0x71   :  { %3070 = vmatprep.mubr.msk.f32.mxu0 %vm149_vm0, %v65_v45  ;;  %3166 = vmatprep.mubr.msk.f32.mxu1 %vm149_vm0, %v129_v46 }
  0x74   :  { %3071 = vmatmul.mubr.msk.f32.gmra.mrb[50].mxu0 %vm149_vm0, %v66_v47  ;;  %3167 = vmatmul.mubr.msk.f32.gmra.mrb[50].mxu1 %vm149_vm0, %v130_v48 }
  0x75   :  { %3169 = vmatprep.mubr.msk.f32.mxu1 %vm149_vm0, %v131_v49  ;;  %3073 = vmatprep.mubr.msk.f32.mxu0 %vm149_vm0, %v67_v50 }
  0x78   :  { %3170 = vmatmul.mubr.msk.f32.gmra.mrb[52].mxu1 %vm149_vm0, %v132_v51  ;;  %3074 = vmatmul.mubr.msk.f32.gmra.mrb[52].mxu0 %vm149_vm0, %v68_v52 }
  0x79   :  { %3076 = vmatprep.mubr.msk.f32.mxu0 %vm149_vm0, %v69_v53  ;;  %3172 = vmatprep.mubr.msk.f32.mxu1 %vm149_vm0, %v133_v54 }
  0x7c   :  { %3077 = vmatmul.mubr.msk.f32.gmra.mrb[54].mxu0 %vm149_vm0, %v70_v55  ;;  %3173 = vmatmul.mubr.msk.f32.gmra.mrb[54].mxu1 %vm149_vm0, %v134_v56 }
  0x7d   :  { %3079 = vmatprep.mubr.msk.f32.mxu0 %vm149_vm0, %v71_v57  ;;  %3175 = vmatprep.mubr.msk.f32.mxu1 %vm149_vm0, %v135_v58 }
  0x80   :  { %3080 = vmatmul.mubr.msk.f32.gmra.mrb[56].mxu0 %vm149_vm0, %v72_v59  ;;  %3176 = vmatmul.mubr.msk.f32.gmra.mrb[56].mxu1 %vm149_vm0, %v136_v60 }
  0x81   :  { %3082 = vmatprep.mubr.msk.f32.mxu0 %vm149_vm0, %v73_v61  ;;  %3178 = vmatprep.mubr.msk.f32.mxu1 %vm149_vm0, %v137_v62 }
  0x84   :  { %3083 = vmatmul.mubr.msk.f32.gmra.mrb[58].mxu0 %vm149_vm0, %v74_v63  ;;  %3179 = vmatmul.mubr.msk.f32.gmra.mrb[58].mxu1 %vm149_vm0, %v138_v0 }
  0x85   :  { %3085 = vmatprep.mubr.msk.f32.mxu0 %vm149_vm0, %v75_v1  ;;  %3181 = vmatprep.mubr.msk.f32.mxu1 %vm149_vm0, %v139_v2 }
  0x88   :  { %3086 = vmatmul.mubr.msk.f32.gmra.mrb[60].mxu0 %vm149_vm0, %v76_v3  ;;  %3182 = vmatmul.mubr.msk.f32.gmra.mrb[60].mxu1 %vm149_vm0, %v140_v4 }
  0x89   :  { %3088 = vmatprep.mubr.msk.f32.mxu0 %vm149_vm0, %v77_v5  ;;  %3184 = vmatprep.mubr.msk.f32.mxu1 %vm149_vm0, %v141_v7 }
  0x8c   :  { %3089 = vmatmul.mubr.msk.f32.gmra.mrb[62].mxu0 %vm149_vm0, %v78_v6  ;;  %3185 = vmatmul.mubr.msk.f32.gmra.mrb[62].mxu1 %vm149_vm0, %v142_v8  ;;  %vm2125_vm0 = vcmask 1048512  }
  0xe3   :  { %v2997_v9 = vpop.f32.mrb[0].mxu0  ;;  %v3093_v10 = vpop.f32.mrb[0].mxu1 }
  0xe4   :  { %3206 = vtanh.f32 %v2997_v9  ;;  %v600_v11 = vpop.f32.mrb[1].mxu0  ;;  %v920_v12 = vpop.f32.mrb[1].mxu1 }
  0xe5   :  { %3208 = vtanh.f32 %v3093_v10 }
  0xe6   :  { %3210 = vtanh.f32 %v920_v12 }
  0xe7   :  { %v3000_v13 = vpop.f32.mrb[2].mxu0  ;;  %v3096_v14 = vpop.f32.mrb[2].mxu1  ;;  %3212 = vtanh.f32 %v600_v11 }
  0xe8   :  { %v610_v15 = vpop.f32.mrb[3].mxu0  ;;  %v930_v16 = vpop.f32.mrb[3].mxu1  ;;  %3214 = vtanh.f32 %v3000_v13 }
  0xe9   :  { %3216 = vtanh.f32 %v930_v16 }
  0xeb   :  { %v3003_v17 = vpop.f32.mrb[4].mxu0  ;;  %v3099_v18 = vpop.f32.mrb[4].mxu1 }
  0xec   :  { %3218 = vtanh.f32 %v3003_v17  ;;  %v620_v19 = vpop.f32.mrb[5].mxu0  ;;  %v940_v20 = vpop.f32.mrb[5].mxu1 }
  0xed   :  { %3220 = vtanh.f32 %v3099_v18 }
  0xee   :  { %v3207_v22 = vpop.eup %3206  ;;  %3222 = vtanh.f32 %v3096_v14 }
  0xef   :  { %v3209_v23 = vpop.eup %3208  ;;  %v1375_v24 = vmul.f32 %v3207_v22, %v4045_v21  ;;  %v3102_v25 = vpop.f32.mrb[6].mxu1  ;;  %3224 = vtanh.f32 %v620_v19 }
  0xf0   :  { %v3006_v26 = vpop.f32.mrb[6].mxu0  ;;  %v950_v28 = vpop.f32.mrb[7].mxu1  ;;  %v1439_v31 = vmul.f32 %v3209_v23, %v4045_v21  ;;  %3226 = vtanh.f32 %v610_v15 }
  0xf1   :  { %v630_v27 = vpop.f32.mrb[7].mxu0  ;;  %v3211_v29 = vpop.eup %3210  ;;  %v1506_v30 = vsel %vm1502_vm1, %v1375_v24, 0.0  ;;  %3228 = vtanh.f32 %v3102_v25 }
  0xf2   :  { %v3213_v32 = vpop.eup %3212  ;;  %1507 = vadd.xlane.f32.xlu0 %v1506_v30  ;;  %v1438_v33 = vmul.f32 %v3211_v29, %v4045_v21  ;;  %v1698_v41 = vsel %vm1502_vm1, %v1439_v31, 0.0  ;;  %3230 = vtanh.f32 %v940_v20 }
  0xf3   :  { %v3105_v34 = vpop.f32.mrb[8].mxu1  ;;  %v3009_v35 = vpop.f32.mrb[8].mxu0  ;;  %v1374_v42 = vmul.f32 %v3213_v32, %v4045_v21  ;;  %3232 = vtanh.f32 %v950_v28 }
  0xf4   :  { %v3215_v36 = vpop.eup %3214  ;;  %v1695_v37 = vsel %vm1502_vm1, %v1438_v33, 0.0  ;;  %v4052_v38 = vpop.f32.mrb[9].mxu1  ;;  %3234 = vtanh.f32 %v3006_v26 }
  0xf5   :  { %v4054_v39 = vpop.f32.mrb[9].mxu0  ;;  %v3217_v40 = vpop.eup %3216  ;;  %1696 = vadd.xlane.f32.xlu1 %v1695_v37  ;;  %v1503_v52 = vsel %vm1502_vm1, %v1374_v42, 0.0  ;;  %v1377_v53 = vmul.f32 %v3215_v36, %v4045_v21  ;;  %3236 = vtanh.f32 %v3009_v35 }
  0xf6   :  { %v3219_v43 = vpop.eup %3218  ;;  %1699 = vadd.xlane.f32.xlu0 %v1698_v41  ;;  %v1440_v44 = vmul.f32 %v3217_v40, %v4045_v21  ;;  %3238 = vtanh.f32 %v630_v27 }
  0xf7   :  { %v1379_v45 = vmul.f32 %v3219_v43, %v4045_v21  ;;  %v4060_v46 = vpop.f32.mrb[10].mxu1  ;;  %v4062_v47 = vpop.f32.mrb[10].mxu0  ;;  %v1512_v62 = vsel %vm1502_vm1, %v1377_v53, 0.0 }
  0xf8   :  { %v3221_v48 = vpop.eup %3220  ;;  %v1701_v49 = vsel %vm1502_vm1, %v1440_v44, 0.0  ;;  %v4065_v50 = vpop.f32.mrb[11].mxu1 }
  0xf9   :  { %v4067_v51 = vpop.f32.mrb[11].mxu0  ;;  %1702 = vadd.xlane.f32.xlu1 %v1701_v49  ;;  %v3223_v54 = vpop.eup %3222  ;;  %v1518_v55 = vsel %vm1502_vm1, %v1379_v45, 0.0  ;;  %v1443_v56 = vmul.f32 %v3221_v48, %v4045_v21 }
  0xfa   :  { %1504 = vadd.xlane.f32.xlu0 %v1503_v52  ;;  %v3225_v61 = vpop.eup %3224  ;;  %v1441_v63 = vmul.f32 %v3223_v54, %v4045_v21 }
  0xfb   :  { %v4073_v57 = vpop.f32.mrb[12].mxu1  ;;  %v4075_v58 = vpop.f32.mrb[12].mxu0  ;;  %v1710_v1 = vsel %vm1502_vm1, %v1443_v56, 0.0  ;;  %v1378_v5 = vmul.f32 %v3225_v61, %v4045_v21 }
  0xfc   :  { %v4077_v59 = vpop.f32.mrb[13].mxu1  ;;  %v4079_v60 = vpop.f32.mrb[13].mxu0  ;;  %v1704_v8 = vsel %vm1502_vm1, %v1441_v63, 0.0 }
  0xfd   :  { %1519 = vadd.xlane.f32.xlu1 %v1518_v55  ;;  %v3227_v0 = vpop.eup %3226  ;;  %v1515_v14 = vsel %vm1502_vm1, %v1378_v5, 0.0 }
  0xfe   :  { %1513 = vadd.xlane.f32.xlu0 %v1512_v62  ;;  %v3229_v2 = vpop.eup %3228  ;;  %v1376_v9 = vmul.f32 %v3227_v0, %v4045_v21 }
  0xff   :  { %v3114_v3 = vpop.f32.mrb[14].mxu1  ;;  %v4084_v4 = vpop.f32.mrb[14].mxu0  ;;  %v1445_v11 = vmul.f32 %v3229_v2, %v4045_v21 }
 0x100   :  { %v990_v6 = vpop.f32.mrb[15].mxu1  ;;  %v4087_v7 = vpop.f32.mrb[15].mxu0  ;;  %3240 = vtanh.f32 %v3114_v3  ;;  %v1509_v18 = vsel %vm1502_vm1, %v1376_v9, 0.0 }
 0x101   :  { %1711 = vadd.xlane.f32.xlu1 %v1710_v1  ;;  %v3231_v10 = vpop.eup %3230  ;;  %3242 = vtanh.f32 %v3105_v34  ;;  %v1716_v22 = vsel %vm1502_vm1, %v1445_v11, 0.0 }
 0x102   :  { %1705 = vadd.xlane.f32.xlu0 %v1704_v8  ;;  %v3233_v17 = vpop.eup %3232  ;;  %v1442_v19 = vmul.f32 %v3231_v10, %v4045_v21  ;;  %3244 = vtanh.f32 %v4054_v39 }
 0x103   :  { %v4092_v12 = vpop.f32.mrb[16].mxu0  ;;  %v4094_v13 = vpop.f32.mrb[16].mxu1  ;;  %3246 = vtanh.f32 %v990_v6  ;;  %v1444_v25 = vmul.f32 %v3233_v17, %v4045_v21 }
 0x104   :  { %v4097_v15 = vpop.f32.mrb[17].mxu0  ;;  %v1000_v16 = vpop.f32.mrb[17].mxu1  ;;  %v1707_v29 = vsel %vm1502_vm1, %v1442_v19, 0.0 }
 0x105   :  { %1516 = vadd.xlane.f32.xlu1 %v1515_v14  ;;  %v3235_v20 = vpop.eup %3234  ;;  %3248 = vtanh.f32 %v1000_v16  ;;  %v1713_v35 = vsel %vm1502_vm1, %v1444_v25, 0.0 }
 0x106   :  { %1510 = vadd.xlane.f32.xlu0 %v1509_v18  ;;  %v3237_v28 = vpop.eup %3236  ;;  %v1381_v30 = vmul.f32 %v3235_v20, %v4045_v21  ;;  %3250 = vtanh.f32 %v4052_v38 }
 0x107   :  { %v4103_v23 = vpop.f32.mrb[18].mxu0  ;;  %v4105_v24 = vpop.f32.mrb[18].mxu1  ;;  %v1383_v36 = vmul.f32 %v3237_v28, %v4045_v21 }
 0x108   :  { %v4108_v26 = vpop.f32.mrb[19].mxu0  ;;  %v4110_v27 = vpop.f32.mrb[19].mxu1  ;;  %v1524_v41 = vsel %vm1502_vm1, %v1381_v30, 0.0 }
 0x109   :  { %1717 = vadd.xlane.f32.xlu1 %v1716_v22  ;;  %v3239_v31 = vpop.eup %3238  ;;  %v1530_v45 = vsel %vm1502_vm1, %v1383_v36, 0.0 }
 0x10a   :  { %1708 = vadd.xlane.f32.xlu0 %v1707_v29  ;;  %v3241_v34 = vpop.eup %3240  ;;  %v1380_v42 = vmul.f32 %v3239_v31, %v4045_v21 }
 0x10b   :  { %v3027_v32 = vpop.f32.mrb[20].mxu0  ;;  %v3123_v33 = vpop.f32.mrb[20].mxu1  ;;  %v1453_v38 = vmul.f32 %v3241_v34, %v4045_v21 }
 0x10c   :  { %v700_v37 = vpop.f32.mrb[21].mxu0  ;;  %v1020_v39 = vpop.f32.mrb[21].mxu1  ;;  %3252 = vtanh.f32 %v3027_v32  ;;  %v1521_v54 = vsel %vm1502_vm1, %v1380_v42, 0.0 }
 0x10d   :  { %v3243_v40 = vpop.eup %3242  ;;  %1714 = vadd.xlane.f32.xlu1 %v1713_v35  ;;  %3254 = vtanh.f32 %v4062_v47  ;;  %v1740_v47 = vsel %vm1502_vm1, %v1453_v38, 0.0 }
 0x10e   :  { %1525 = vadd.xlane.f32.xlu0 %v1524_v41  ;;  %v1447_v48 = vmul.f32 %v3243_v40, %v4045_v21  ;;  %v3245_v53 = vpop.eup %3244  ;;  %3256 = vtanh.f32 %v3123_v33 }
 0x10f   :  { %v3126_v43 = vpop.f32.mrb[22].mxu1  ;;  %v4121_v44 = vpop.f32.mrb[22].mxu0  ;;  %3258 = vtanh.f32 %v4060_v46  ;;  %v1382_v0 = vmul.f32 %v3245_v53, %v4045_v21 }
 0x110   :  { %v4125_v49 = vpop.f32.mrb[23].mxu1  ;;  %v4127_v52 = vpop.f32.mrb[23].mxu0  ;;  %v1722_v63 = vsel %vm1502_vm1, %v1447_v48, 0.0  ;;  %3260 = vtanh.f32 %v4067_v51 }
 0x111   :  { %1531 = vadd.xlane.f32.xlu1 %v1530_v45  ;;  %v3247_v55 = vpop.eup %3246  ;;  %3262 = vtanh.f32 %v700_v37  ;;  %v1527_v10 = vsel %vm1502_vm1, %v1382_v0, 0.0 }
 0x112   :  { %1522 = vadd.xlane.f32.xlu0 %v1521_v54  ;;  %v3249_v62 = vpop.eup %3248  ;;  %v1452_v5 = vmul.f32 %v3247_v55, %v4045_v21  ;;  %3264 = vtanh.f32 %v4065_v50 }
 0x113   :  { %v4132_v56 = vpop.f32.mrb[24].mxu0  ;;  %v4134_v61 = vpop.f32.mrb[24].mxu1  ;;  %v1454_v46 = vmul.f32 %v3249_v62, %v4045_v21  ;;  %3266 = vtanh.f32 %v1020_v39 }
 0x114   :  { %v4138_v1 = vpop.f32.mrb[25].mxu0  ;;  %v4140_v2 = vpop.f32.mrb[25].mxu1  ;;  %v1737_v51 = vsel %vm1502_vm1, %v1452_v5, 0.0  ;;  %3268 = vtanh.f32 %v3126_v43 }
 0x115   :  { %v3251_v3 = vpop.eup %3250  ;;  %1723 = vadd.xlane.f32.xlu1 %v1722_v63  ;;  %v1743_v18 = vsel %vm1502_vm1, %v1454_v46, 0.0  ;;  %3270 = vtanh.f32 %v4075_v58 }
 0x116   :  { %1741 = vadd.xlane.f32.xlu0 %v1740_v47  ;;  %v3253_v9 = vpop.eup %3252  ;;  %v1446_v11 = vmul.f32 %v3251_v3, %v4045_v21  ;;  %3272 = vtanh.f32 %v4073_v57 }
 0x117   :  { %v4145_v6 = vpop.f32.mrb[26].mxu0  ;;  %v4147_v8 = vpop.f32.mrb[26].mxu1  ;;  %v1395_v19 = vmul.f32 %v3253_v9, %v4045_v21  ;;  %3274 = vtanh.f32 %v4125_v49 }
 0x118   :  { %v4151_v14 = vpop.f32.mrb[27].mxu0  ;;  %v4153_v16 = vpop.f32.mrb[27].mxu1  ;;  %v1719_v28 = vsel %vm1502_vm1, %v1446_v11, 0.0  ;;  %3276 = vtanh.f32 %v4132_v56 }
 0x119   :  { %v3255_v17 = vpop.eup %3254  ;;  %1528 = vadd.xlane.f32.xlu1 %v1527_v10  ;;  %v1566_v50 = vsel %vm1502_vm1, %v1395_v19, 0.0  ;;  %3278 = vtanh.f32 %v4079_v60 }
 0x11a   :  { %1738 = vadd.xlane.f32.xlu0 %v1737_v51  ;;  %v3257_v25 = vpop.eup %3256  ;;  %v1385_v29 = vmul.f32 %v3255_v17, %v4045_v21  ;;  %3280 = vtanh.f32 %v4134_v61 }
 0x11b   :  { %v4159_v20 = vpop.f32.mrb[28].mxu0  ;;  %v4161_v22 = vpop.f32.mrb[28].mxu1  ;;  %v1459_v33 = vmul.f32 %v3257_v25, %v4045_v21  ;;  %3282 = vtanh.f32 %v4077_v59 }
 0x11c   :  { %v4165_v30 = vpop.f32.mrb[29].mxu0  ;;  %v4167_v31 = vpop.f32.mrb[29].mxu1  ;;  %v1536_v36 = vsel %vm1502_vm1, %v1385_v29, 0.0  ;;  %3284 = vtanh.f32 %v4084_v4 }
 0x11d   :  { %v3259_v32 = vpop.eup %3258  ;;  %1720 = vadd.xlane.f32.xlu1 %v1719_v28  ;;  %v1758_v58 = vsel %vm1502_vm1, %v1459_v33, 0.0  ;;  %3286 = vtanh.f32 %v4138_v1 }
 0x11e   :  { %1744 = vadd.xlane.f32.xlu0 %v1743_v18  ;;  %v1449_v37 = vmul.f32 %v3259_v32, %v4045_v21  ;;  %v3261_v41 = vpop.eup %3260  ;;  %3288 = vtanh.f32 %v4087_v7 }
 0x11f   :  { %v4172_v34 = vpop.f32.mrb[30].mxu0  ;;  %v4174_v35 = vpop.f32.mrb[30].mxu1  ;;  %v1384_v48 = vmul.f32 %v3261_v41, %v4045_v21  ;;  %3290 = vtanh.f32 %v4140_v2 }
 0x120   :  { %v4178_v39 = vpop.f32.mrb[31].mxu0  ;;  %v4180_v40 = vpop.f32.mrb[31].mxu1  ;;  %v1728_v45 = vsel %vm1502_vm1, %v1449_v37, 0.0  ;;  %3292 = vtanh.f32 %v4145_v6 }
 0x121   :  { %1537 = vadd.xlane.f32.xlu1 %v1536_v36  ;;  %v3263_v42 = vpop.eup %3262  ;;  %v1533_v0 = vsel %vm1502_vm1, %v1384_v48, 0.0  ;;  %3294 = vtanh.f32 %v4092_v12 }
 0x122   :  { %1567 = vadd.xlane.f32.xlu0 %v1566_v50  ;;  %v3265_v55 = vpop.eup %3264  ;;  %v1394_v57 = vmul.f32 %v3263_v42, %v4045_v21  ;;  %3296 = vtanh.f32 %v4147_v8 }
 0x123   :  { %v4184_v38 = vpop.f32.mrb[32].mxu0  ;;  %v4186_v43 = vpop.f32.mrb[32].mxu1  ;;  %v1448_v3 = vmul.f32 %v3265_v55, %v4045_v21 }
 0x124   :  { %v4191_v53 = vpop.f32.mrb[33].mxu0  ;;  %v4193_v54 = vpop.f32.mrb[33].mxu1  ;;  %v1563_v10 = vsel %vm1502_vm1, %v1394_v57, 0.0 }
 0x125   :  { %1729 = vadd.xlane.f32.xlu1 %v1728_v45  ;;  %v3267_v47 = vpop.eup %3266  ;;  %v1725_v51 = vsel %vm1502_vm1, %v1448_v3, 0.0  ;;  %3298 = vtanh.f32 %v4094_v13 }
 0x126   :  { %1759 = vadd.xlane.f32.xlu0 %v1758_v58  ;;  %v3269_v63 = vpop.eup %3268  ;;  %v1458_v56 = vmul.f32 %v3267_v47, %v4045_v21  ;;  %3300 = vtanh.f32 %v4097_v15 }
 0x127   :  { %v4198_v62 = vpop.f32.mrb[34].mxu1  ;;  %v4200_v49 = vpop.f32.mrb[34].mxu0  ;;  %v1461_v60 = vmul.f32 %v3269_v63, %v4045_v21 }
 0x128   :  { %v4204_v5 = vpop.f32.mrb[35].mxu1  ;;  %v4206_v46 = vpop.f32.mrb[35].mxu0  ;;  %v1755_v61 = vsel %vm1502_vm1, %v1458_v56, 0.0 }
 0x129   :  { %v3271_v9 = vpop.eup %3270  ;;  %1534 = vadd.xlane.f32.xlu1 %v1533_v0  ;;  %v1764_v59 = vsel %vm1502_vm1, %v1461_v60, 0.0  ;;  %3302 = vtanh.f32 %v4151_v14 }
 0x12a   :  { %1564 = vadd.xlane.f32.xlu0 %v1563_v10  ;;  %v1387_v18 = vmul.f32 %v3271_v9, %v4045_v21  ;;  %v3273_v28 = vpop.eup %3272  ;;  %3304 = vtanh.f32 %v4103_v23 }
 0x12b   :  { %v4213_v11 = vpop.f32.mrb[36].mxu1  ;;  %v4215_v17 = vpop.f32.mrb[36].mxu0  ;;  %v1451_v37 = vmul.f32 %v3273_v28, %v4045_v21 }
 0x12c   :  { %v4219_v19 = vpop.f32.mrb[37].mxu1  ;;  %v4221_v25 = vpop.f32.mrb[37].mxu0  ;;  %v1542_v36 = vsel %vm1502_vm1, %v1387_v18, 0.0 }
 0x12d   :  { %1726 = vadd.xlane.f32.xlu1 %v1725_v51  ;;  %v3275_v29 = vpop.eup %3274  ;;  %v1734_v57 = vsel %vm1502_vm1, %v1451_v37, 0.0  ;;  %3306 = vtanh.f32 %v4153_v16 }
 0x12e   :  { %1756 = vadd.xlane.f32.xlu0 %v1755_v61  ;;  %v3277_v33 = vpop.eup %3276  ;;  %v1460_v4 = vmul.f32 %v3275_v29, %v4045_v21  ;;  %3308 = vtanh.f32 %v4159_v20 }
 0x12f   :  { %v4226_v32 = vpop.f32.mrb[38].mxu1  ;;  %v4228_v50 = vpop.f32.mrb[38].mxu0  ;;  %v1399_v45 = vmul.f32 %v3277_v33, %v4045_v21 }
 0x130   :  { %v4233_v41 = vpop.f32.mrb[39].mxu1  ;;  %v4235_v42 = vpop.f32.mrb[39].mxu0  ;;  %v1761_v7 = vsel %vm1502_vm1, %v1460_v4, 0.0 }
 0x131   :  { %v3279_v58 = vpop.eup %3278  ;;  %1543 = vadd.xlane.f32.xlu1 %v1542_v36  ;;  %v1578_v9 = vsel %vm1502_vm1, %v1399_v45, 0.0  ;;  %3310 = vtanh.f32 %v4105_v24 }
 0x132   :  { %1765 = vadd.xlane.f32.xlu0 %v1764_v59  ;;  %v3281_v55 = vpop.eup %3280  ;;  %v1386_v47 = vmul.f32 %v3279_v58, %v4045_v21  ;;  %3312 = vtanh.f32 %v4108_v26 }
 0x133   :  { %v4240_v48 = vpop.f32.mrb[40].mxu1  ;;  %v4242_v1 = vpop.f32.mrb[40].mxu0  ;;  %v1463_v2 = vmul.f32 %v3281_v55, %v4045_v21 }
 0x134   :  { %v4247_v63 = vpop.f32.mrb[41].mxu1  ;;  %v4249_v0 = vpop.f32.mrb[41].mxu0  ;;  %v1539_v60 = vsel %vm1502_vm1, %v1386_v47, 0.0 }
 0x135   :  { %v3283_v3 = vpop.eup %3282  ;;  %1735 = vadd.xlane.f32.xlu1 %v1734_v57  ;;  %v1770_v12 = vsel %vm1502_vm1, %v1463_v2, 0.0  ;;  %3314 = vtanh.f32 %v4165_v30 }
 0x136   :  { %1762 = vadd.xlane.f32.xlu0 %v1761_v7  ;;  %v1450_v51 = vmul.f32 %v3283_v3, %v4045_v21  ;;  %v3285_v61 = vpop.eup %3284  ;;  %3316 = vtanh.f32 %v4167_v31 }
 0x137   :  { %v4256_v10 = vpop.f32.mrb[42].mxu1  ;;  %v4258_v56 = vpop.f32.mrb[42].mxu0  ;;  %v1389_v36 = vmul.f32 %v3285_v61, %v4045_v21 }
 0x138   :  { %v4262_v18 = vpop.f32.mrb[43].mxu1  ;;  %v4264_v28 = vpop.f32.mrb[43].mxu0  ;;  %v1731_v33 = vsel %vm1502_vm1, %v1450_v51, 0.0 }
 0x139   :  { %1540 = vadd.xlane.f32.xlu1 %v1539_v60  ;;  %v3287_v6 = vpop.eup %3286  ;;  %v1548_v47 = vsel %vm1502_vm1, %v1389_v36, 0.0  ;;  %3318 = vtanh.f32 %v4110_v27 }
 0x13a   :  { %1579 = vadd.xlane.f32.xlu0 %v1578_v9  ;;  %v3289_v4 = vpop.eup %3288  ;;  %v1398_v8 = vmul.f32 %v3287_v6, %v4045_v21  ;;  %3320 = vtanh.f32 %v4172_v34 }
 0x13b   :  { %v4269_v29 = vpop.f32.mrb[44].mxu1  ;;  %v4271_v59 = vpop.f32.mrb[44].mxu0  ;;  %v1388_v3 = vmul.f32 %v3289_v4, %v4045_v21 }
 0x13c   :  { %v4275_v37 = vpop.f32.mrb[45].mxu1  ;;  %v4277_v58 = vpop.f32.mrb[45].mxu0  ;;  %v1575_v60 = vsel %vm1502_vm1, %v1398_v8, 0.0 }
 0x13d   :  { %1732 = vadd.xlane.f32.xlu1 %v1731_v33  ;;  %v3291_v45 = vpop.eup %3290  ;;  %3322 = vtanh.f32 %v4121_v44 }
 0x13e   :  { %1771 = vadd.xlane.f32.xlu0 %v1770_v12  ;;  %v3293_v57 = vpop.eup %3292  ;;  %v1462_v15 = vmul.f32 %v3291_v45, %v4045_v21  ;;  %v1545_v12 = vsel %vm1502_vm1, %v1388_v3, 0.0  ;;  %3324 = vtanh.f32 %v4174_v35 }
 0x13f   :  { %v4281_v13 = vpop.f32.mrb[46].mxu0  ;;  %v4283_v55 = vpop.f32.mrb[46].mxu1  ;;  %v1401_v51 = vmul.f32 %v3293_v57, %v4045_v21 }
 0x140   :  { %v4288_v7 = vpop.f32.mrb[47].mxu0  ;;  %v4290_v9 = vpop.f32.mrb[47].mxu1  ;;  %v1767_v23 = vsel %vm1502_vm1, %v1462_v15, 0.0 }
 0x141   :  { %5082 = vst [vmem:[#allocation5_spill] sm:$0xff] %v4288_v7  ;;  %5083 = vst [vmem:[#allocation6_spill] sm:$0xff] %v4290_v9  ;;  %v3295_v2 = vpop.eup %3294  ;;  %1549 = vadd.xlane.f32.xlu1 %v1548_v47  ;;  %v1584_v45 = vsel %vm1502_vm1, %v1401_v51, 0.0  ;;  %3326 = vtanh.f32 %v4127_v52 }
 0x142   :  { %1576 = vadd.xlane.f32.xlu0 %v1575_v60  ;;  %v3297_v6 = vpop.eup %3296  ;;  %v1391_v33 = vmul.f32 %v3295_v2, %v4045_v21  ;;  %3328 = vtanh.f32 %v4161_v22 }
 0x143   :  { %v4296_v14 = vpop.f32.mrb[48].mxu0  ;;  %v4298_v61 = vpop.f32.mrb[48].mxu1  ;;  %v1465_v16 = vmul.f32 %v3297_v6, %v4045_v21 }
 0x144   :  { %v4303_v36 = vpop.f32.mrb[49].mxu0  ;;  %v4305_v4 = vpop.f32.mrb[49].mxu1  ;;  %v1554_v3 = vsel %vm1502_vm1, %v1391_v33, 0.0 }
 0x145   :  { %5084 = vst [vmem:[#allocation7_spill] sm:$0xff] %v4303_v36  ;;  %5085 = vst [vmem:[#allocation8_spill] sm:$0xff] %v4305_v4  ;;  %v3299_v8 = vpop.eup %3298  ;;  %1546 = vadd.xlane.f32.xlu1 %v1545_v12  ;;  %v1776_v24 = vsel %vm1502_vm1, %v1465_v16, 0.0  ;;  %3330 = vtanh.f32 %v4178_v39 }
 0x146   :  { %1768 = vadd.xlane.f32.xlu0 %v1767_v23  ;;  %v1455_v2 = vmul.f32 %v3299_v8, %v4045_v21  ;;  %v3301_v12 = vpop.eup %3300  ;;  %3332 = vtanh.f32 %v4191_v53 }
 0x147   :  { %v4312_v57 = vpop.f32.mrb[50].mxu0  ;;  %v4314_v47 = vpop.f32.mrb[50].mxu1  ;;  %v1390_v8 = vmul.f32 %v3301_v12, %v4045_v21 }
 0x148   :  { %v4318_v60 = vpop.f32.mrb[51].mxu0  ;;  %v4320_v15 = vpop.f32.mrb[51].mxu1  ;;  %v1746_v33 = vsel %vm1502_vm1, %v1455_v2, 0.0 }
 0x149   :  { %1555 = vadd.xlane.f32.xlu1 %v1554_v3  ;;  %v3303_v20 = vpop.eup %3302  ;;  %v1551_v12 = vsel %vm1502_vm1, %v1390_v8, 0.0  ;;  %3334 = vtanh.f32 %v4180_v40 }
 0x14a   :  { %1585 = vadd.xlane.f32.xlu0 %v1584_v45  ;;  %v3305_v3 = vpop.eup %3304  ;;  %v1400_v26 = vmul.f32 %v3303_v20, %v4045_v21  ;;  %3336 = vtanh.f32 %v4184_v38 }
 0x14b   :  { %v4324_v51 = vpop.f32.mrb[52].mxu1  ;;  %v4326_v6 = vpop.f32.mrb[52].mxu0 }
 0x14c   :  { %5086 = vst [vmem:[#allocation9_spill] sm:$0xff] %v4326_v6  ;;  %v4331_v23 = vpop.f32.mrb[53].mxu1  ;;  %v4333_v4 = vpop.f32.mrb[53].mxu0  ;;  %v1393_v6 = vmul.f32 %v3305_v3, %v4045_v21 }
 0x14d   :  { %5087 = vst [vmem:[#allocation10_spill] sm:$0xff] %v4333_v4  ;;  %1747 = vadd.xlane.f32.xlu1 %v1746_v33  ;;  %v3307_v45 = vpop.eup %3306  ;;  %3338 = vtanh.f32 %v4193_v54 }
 0x14e   :  { %1777 = vadd.xlane.f32.xlu0 %v1776_v24  ;;  %v3309_v30 = vpop.eup %3308  ;;  %v1581_v24 = vsel %vm1502_vm1, %v1400_v26, 0.0  ;;  %v1464_v31 = vmul.f32 %v3307_v45, %v4045_v21  ;;  %v1560_v36 = vsel %vm1502_vm1, %v1393_v6, 0.0  ;;  %3340 = vtanh.f32 %v4186_v43 }
 0x14f   :  { %v4338_v16 = vpop.f32.mrb[54].mxu0  ;;  %v4340_v2 = vpop.f32.mrb[54].mxu1  ;;  %v1403_v27 = vmul.f32 %v3309_v30, %v4045_v21 }
 0x150   :  { %v4344_v4 = vpop.f32.mrb[55].mxu0  ;;  %v4346_v33 = vpop.f32.mrb[55].mxu1  ;;  %v1773_v34 = vsel %vm1502_vm1, %v1464_v31, 0.0 }
 0x151   :  { %v3311_v20 = vpop.eup %3310  ;;  %1552 = vadd.xlane.f32.xlu1 %v1551_v12  ;;  %v1590_v44 = vsel %vm1502_vm1, %v1403_v27, 0.0  ;;  %3342 = vtanh.f32 %v4206_v46 }
 0x152   :  { %1582 = vadd.xlane.f32.xlu0 %v1581_v24  ;;  %v1457_v9 = vmul.f32 %v3311_v20, %v4045_v21  ;;  %v3313_v45 = vpop.eup %3312  ;;  %3344 = vtanh.f32 %v4200_v49 }
 0x153   :  { %v4353_v8 = vpop.f32.mrb[56].mxu0  ;;  %v4355_v3 = vpop.f32.mrb[56].mxu1 }
 0x154   :  { %v4359_v12 = vpop.f32.mrb[57].mxu0  ;;  %v4361_v26 = vpop.f32.mrb[57].mxu1  ;;  %v1752_v7 = vsel %vm1502_vm1, %v1457_v9, 0.0 }
 0x155   :  { %5088 = vst [vmem:[#allocation11_spill] sm:$0xff] %v4361_v26  ;;  %1561 = vadd.xlane.f32.xlu1 %v1560_v36  ;;  %v3315_v24 = vpop.eup %3314  ;;  %v1392_v26 = vmul.f32 %v3313_v45, %v4045_v21  ;;  %3346 = vtanh.f32 %v4204_v5 }
 0x156   :  { %1774 = vadd.xlane.f32.xlu0 %v1773_v34  ;;  %v3317_v20 = vpop.eup %3316  ;;  %v1402_v35 = vmul.f32 %v3315_v24, %v4045_v21  ;;  %3348 = vtanh.f32 %v4198_v62 }
 0x157   :  { %v4367_v30 = vpop.f32.mrb[58].mxu0  ;;  %v4369_v6 = vpop.f32.mrb[58].mxu1  ;;  %v1466_v52 = vmul.f32 %v3317_v20, %v4045_v21  ;;  %v1557_v45 = vsel %vm1502_vm1, %v1392_v26, 0.0 }
 0x158   :  { %5089 = vst [vmem:[#allocation12_spill] sm:$0xff] %v4369_v6  ;;  %v4373_v36 = vpop.f32.mrb[59].mxu0  ;;  %v4375_v31 = vpop.f32.mrb[59].mxu1  ;;  %v1587_v22 = vsel %vm1502_vm1, %v1402_v35, 0.0 }
 0x159   :  { %5090 = vst [vmem:[#allocation13_spill] sm:$0xff] %v4373_v36  ;;  %5091 = vst [vmem:[#allocation14_spill] sm:$0xff] %v4375_v31  ;;  %v3319_v34 = vpop.eup %3318  ;;  %1753 = vadd.xlane.f32.xlu1 %v1752_v7  ;;  %3350 = vtanh.f32 %v4215_v17 }
 0x15a   :  { %1591 = vadd.xlane.f32.xlu0 %v1590_v44  ;;  %v3321_v9 = vpop.eup %3320  ;;  %v1456_v31 = vmul.f32 %v3319_v34, %v4045_v21  ;;  %v1779_v44 = vsel %vm1502_vm1, %v1466_v52, 0.0  ;;  %3352 = vtanh.f32 %v4213_v11 }
 0x15b   :  { %v4380_v27 = vpop.f32.mrb[60].mxu0  ;;  %v4382_v6 = vpop.f32.mrb[60].mxu1  ;;  %v1405_v39 = vmul.f32 %v3321_v9, %v4045_v21 }
 0x15c   :  { %v4387_v36 = vpop.f32.mrb[61].mxu0  ;;  %v4389_v7 = vpop.f32.mrb[61].mxu1 }
 0x15d   :  { %5092 = vst [vmem:[#allocation15_spill] sm:$0xff] %v4387_v36  ;;  %5093 = vst [vmem:[#allocation16_spill] sm:$0xff] %v4389_v7  ;;  %v3323_v24 = vpop.eup %3322  ;;  %1558 = vadd.xlane.f32.xlu1 %v1557_v45  ;;  %v1749_v7 = vsel %vm1502_vm1, %v1456_v31, 0.0  ;;  %v1596_v40 = vsel %vm1502_vm1, %v1405_v39, 0.0  ;;  %3354 = vtanh.f32 %v4235_v42 }
 0x15e   :  { %1588 = vadd.xlane.f32.xlu0 %v1587_v22  ;;  %v3325_v34 = vpop.eup %3324  ;;  %v1397_v45 = vmul.f32 %v3323_v24, %v4045_v21  ;;  %3356 = vtanh.f32 %v4269_v29 }
 0x15f   :  { %v4396_v26 = vpop.f32.mrb[62].mxu0  ;;  %v4398_v20 = vpop.f32.mrb[62].mxu1  ;;  %v1469_v52 = vmul.f32 %v3325_v34, %v4045_v21 }
 0x160   :  { %v4402_v36 = vpop.f32.mrb[63].mxu0  ;;  %v4404_v35 = vpop.f32.mrb[63].mxu1  ;;  %v1572_v9 = vsel %vm1502_vm1, %v1397_v45, 0.0 }
 0x161   :  { %v3327_v53 = vpop.eup %3326  ;;  %1750 = vadd.xlane.f32.xlu1 %v1749_v7  ;;  %v1788_v7 = vsel %vm1502_vm1, %v1469_v52, 0.0  ;;  %3358 = vtanh.f32 %v4221_v25 }
 0x162   :  { %1780 = vadd.xlane.f32.xlu0 %v1779_v44  ;;  %v1396_v31 = vmul.f32 %v3327_v53, %v4045_v21  ;;  %v3329_v24 = vpop.eup %3328  ;;  %3360 = vtanh.f32 %v4219_v19 }
 0x163   :  { %v3331_v22 = vpop.eup %3330  ;;  %v1467_v39 = vmul.f32 %v3329_v24, %v4045_v21  ;;  %3362 = vtanh.f32 %v4275_v37 }
 0x164   :  { %v3333_v44 = vpop.eup %3332  ;;  %v1569_v38 = vsel %vm1502_vm1, %v1396_v31, 0.0  ;;  %v1404_v34 = vmul.f32 %v3331_v22, %v4045_v21  ;;  %3364 = vtanh.f32 %v4296_v14 }
 0x165   :  { %1573 = vadd.xlane.f32.xlu1 %v1572_v9  ;;  %v3335_v54 = vpop.eup %3334  ;;  %v1406_v45 = vmul.f32 %v3333_v44, %v4045_v21  ;;  %v1782_v43 = vsel %vm1502_vm1, %v1467_v39, 0.0  ;;  %3366 = vtanh.f32 %v4228_v50 }
 0x166   :  { %1597 = vadd.xlane.f32.xlu0 %v1596_v40  ;;  %v1468_v53 = vmul.f32 %v3335_v54, %v4045_v21  ;;  %v3337_v40 = vpop.eup %3336  ;;  %v1593_v46 = vsel %vm1502_vm1, %v1404_v34, 0.0  ;;  %v1887_v54 = vlaneseq  ;;  %3368 = vtanh.f32 %v4298_v61 }
 0x167   :  { %v3339_v52 = vpop.eup %3338  ;;  %v1599_v9 = vsel %vm1502_vm1, %v1406_v45, 0.0  ;;  %v1407_v5 = vmul.f32 %v3337_v40, %v4045_v21  ;;  %3370 = vtanh.f32 %v4226_v32 }
 0x168   :  { %v1785_v49 = vsel %vm1502_vm1, %v1468_v53, 0.0  ;;  %v3341_v31 = vpop.eup %3340  ;;  %v1470_v24 = vmul.f32 %v3339_v52, %v4045_v21  ;;  %v4442_v40 = vand.u32 127, %v1887_v54  ;;  %v4447_v29 = vshrl.u32 %v1887_v54, 7 }
 0x169   :  { %1570 = vadd.xlane.f32.xlu1 %v1569_v38  ;;  %v3343_v22 = vpop.eup %3342  ;;  %v1602_v62 = vsel %vm1502_vm1, %v1407_v5, 0.0  ;;  %3372 = vtanh.f32 %v4312_v57 }
 0x16a   :  { %1789 = vadd.xlane.f32.xlu0 %v1788_v7  ;;  %v1471_v7 = vmul.f32 %v3341_v31, %v4045_v21  ;;  %v3345_v44 = vpop.eup %3344  ;;  %v1791_v17 = vsel %vm1502_vm1, %v1470_v24, 0.0  ;;  %v1408_v38 = vmul.f32 %v3343_v22, %v4045_v21  ;;  %v2022_v31 = vadd.s32 4294967288, %v4442_v40 }
 0x16b   :  { %v3347_v39 = vpop.eup %3346  ;;  %v1409_v42 = vmul.f32 %v3345_v44, %v4045_v21  ;;  %v2029_v37 = vadd.s32 4294967280, %v4442_v40  ;;  %3374 = vtanh.f32 %v4233_v41 }
 0x16c   :  { %v1794_v11 = vsel %vm1502_vm1, %v1471_v7, 0.0  ;;  %v3349_v34 = vpop.eup %3348  ;;  %v1605_v45 = vsel %vm1502_vm1, %v1408_v38, 0.0  ;;  %v4465_v50 = vsub.s32 %v2022_v31, %v4447_v29  ;;  %3376 = vtanh.f32 %v4314_v47 }
 0x16d   :  { %1783 = vadd.xlane.f32.xlu1 %v1782_v43  ;;  %v1472_v43 = vmul.f32 %v3347_v39, %v4045_v21  ;;  %v3351_v53 = vpop.eup %3350  ;;  %v1608_v25 = vsel %vm1502_vm1, %v1409_v42, 0.0  ;;  %v4470_v54 = vsub.s32 %v2029_v37, %v4447_v29  ;;  %3378 = vtanh.f32 %v4242_v1 }
 0x16e   :  { %1594 = vadd.xlane.f32.xlu0 %v1593_v46  ;;  %v1473_v46 = vmul.f32 %v3349_v34, %v4045_v21  ;;  %v3353_v52 = vpop.eup %3352  ;;  %v2043_v1 = vadd.s32 4294967264, %v4442_v40  ;;  %3380 = vtanh.f32 %v4240_v48 }
 0x16f   :  { %v3355_v5 = vpop.eup %3354  ;;  %v1475_v7 = vmul.f32 %v3353_v52, %v4045_v21  ;;  %3382 = vtanh.f32 %v4318_v60  ;;  %v2057_v60 = vadd.s32 4294967248, %v4442_v40 }
 0x170   :  { %v3357_v24 = vpop.eup %3356  ;;  %v1800_v22 = vsel %vm1502_vm1, %v1473_v46, 0.0  ;;  %v1412_v14 = vmul.f32 %v3355_v5, %v4045_v21  ;;  %3384 = vtanh.f32 %v4249_v0 }
 0x171   :  { %1786 = vadd.xlane.f32.xlu1 %v1785_v49  ;;  %v1411_v49 = vmul.f32 %v3351_v53, %v4045_v21  ;;  %v3359_v44 = vpop.eup %3358  ;;  %3386 = vtanh.f32 %v4320_v15  ;;  %v4542_v15 = vsub.s32 %v2057_v60, %v4447_v29 }
 0x172   :  { %1600 = vadd.xlane.f32.xlu0 %v1599_v9  ;;  %v1797_v9 = vsel %vm1502_vm1, %v1472_v43, 0.0  ;;  %v1410_v43 = vmul.f32 %v3359_v44, %v4045_v21  ;;  %v3361_v53 = vpop.eup %3360  ;;  %v1617_v61 = vsel %vm1502_vm1, %v1412_v14, 0.0  ;;  %3388 = vtanh.f32 %v4247_v63 }
 0x173   :  { %v3363_v32 = vpop.eup %3362  ;;  %3390 = vtanh.f32 %v4324_v51 }
 0x174   :  { %v1611_v37 = vsel %vm1502_vm1, %v1410_v43, 0.0  ;;  %v2050_v43 = vadd.s32 4294967256, %v4442_v40  ;;  %3392 = vtanh.f32 %v4258_v56 }
 0x175   :  { %1603 = vadd.xlane.f32.xlu1 %v1602_v62  ;;  %v4459_v62 = vsub.s32 %v4442_v40, %v4447_v29  ;;  %3394 = vtanh.f32 %v4331_v23 }
 0x176   :  { %1792 = vadd.xlane.f32.xlu0 %v1791_v17  ;;  %v1614_v17 = vsel %vm1502_vm1, %v1411_v49, 0.0  ;;  %v4520_v48 = vsub.s32 %v2050_v43, %v4447_v29 }
 0x179   :  { %1795 = vadd.xlane.f32.xlu1 %v1794_v11  ;;  %v1483_v11 = vmul.f32 %v3357_v24, %v4045_v21  ;;  %v3365_v21 = vpop.eup %3364  ;;  %v4489_v24 = vld [vmem:[%s5080_s2] ss:$0 sm:$0xff]  ;;  %3396 = vtanh.f32 %v4338_v16  ;;  %s3491_s2 = smov [#allocation2]  }
 0x17a   :  { %1606 = vadd.xlane.f32.xlu0 %v1605_v45  ;;  %v1806_v45 = vsel %vm1502_vm1, %v1475_v7, 0.0  ;;  %v1474_v57 = vmul.f32 %v4489_v24, %v3361_v53  ;;  %v3367_v41 = vpop.eup %3366  ;;  %v1482_v7 = vmul.f32 %v4489_v24, %v3363_v32  ;;  %3398 = vtanh.f32 %v4256_v10  ;;  %s2712_s30 = sshll.u32 %s3491_s2, 4  ;;  %s2713_s30 = int_to_ptr.vmem [resolvable:$true] %s2712_s30 }
 0x17b   :  { %v1830_v49 = vsel %vm1502_vm1, %v1483_v11, 0.0  ;;  %s3467_s4 = scalar_lea.vmem %s2713_s30, 128  ;;  %p3472_p1 = scmp.lt.s32.totalorder %s2713_s30, %s2713_s30 }
 0x17c   :  { %v1803_v11 = vsel %vm1502_vm1, %v1474_v57, 0.0  ;;  %p3468_p0 = scmp.ne.s32.totalorder %s2713_s30, %s3467_s4  ;;  %p3473_p2 = scmp.lt.s32.totalorder %s3467_s4, %s3467_s4 }
 0x17d   :  { %1609 = vadd.xlane.f32.xlu1 %v1608_v25 }
 0x17e   :  { %1798 = vadd.xlane.f32.xlu0 %v1797_v9  ;;  %p3474_p3 = por %p3473_p2, %p3472_p1 }
 0x17f   :  { %v1508_v19 = vpop.xlane.xlu0 %1507 }
 0x180   :  { %v2026_v5 = vrot.slane %v1508_v19, %v4465_v50  ;;  %p3475_p4 = pnand %p3474_p3, %p3468_p0 }
 0x181   :  { %1801 = vadd.xlane.f32.xlu1 %v1800_v22 }
 0x182   :  { %v1697_v38 = vpop.xlane.xlu1 %1696  ;;  %1615 = vadd.xlane.f32.xlu0 %v1614_v17  ;;  %v2036_v17 = vadd.s32 4294967272, %v4442_v40 }
 0x183   :  { %v1700_v39 = vpop.xlane.xlu0 %1699  ;;  %v2367_v42 = vrot.slane %v1697_v38, %v4459_v62  ;;  %v1423_v38 = vmul.f32 %v4489_v24, %v3365_v21 }
 0x184   :  { %v2371_v34 = vrot.slane %v1700_v39, %v4465_v50  ;;  %v3369_v39 = vpop.eup %3368  ;;  %v4506_v53 = vsub.s32 %v2036_v17, %v4447_v29  ;;  %3400 = vtanh.f32 %v4340_v2 }
 0x185   :  { %1807 = vadd.xlane.f32.xlu1 %v1806_v45  ;;  %v1827_v45 = vsel %vm1502_vm1, %v1482_v7, 0.0  ;;  %v1650_v32 = vsel %vm1502_vm1, %v1423_v38, 0.0 }
 0x186   :  { %v2372_v25 = vsel %vm2027_vm2, %v2371_v34, %v2367_v42  ;;  %v1703_v46 = vpop.xlane.xlu1 %1702  ;;  %1618 = vadd.xlane.f32.xlu0 %v1617_v61  ;;  %v1413_v42 = vmul.f32 %v4489_v24, %v3367_v41  ;;  %v3371_v34 = vpop.eup %3370  ;;  %3402 = vtanh.f32 %v4264_v28 }
 0x187   :  { %v2376_v52 = vrot.slane %v1703_v46, %v4470_v54  ;;  %v1505_v9 = vpop.xlane.xlu0 %1504  ;;  %v1487_v46 = vmul.f32 %v4489_v24, %v3369_v39  ;;  %v1477_v21 = vmul.f32 %v4489_v24, %v3371_v34 }
 0x188   :  { %v2021_v31 = vrot.slane %v1505_v9, %v4459_v62 }
 0x189   :  { %v2377_v22 = vsel %vm2034_vm3, %v2376_v52, %v2372_v25  ;;  %1612 = vadd.xlane.f32.xlu1 %v1611_v37  ;;  %v2064_v25 = vadd.s32 4294967240, %v4442_v40  ;;  %v3373_v52 = vpop.eup %3372  ;;  %v4524_v37 = vsub.s32 %v2043_v1, %v4447_v29  ;;  %v1842_v17 = vsel %vm1502_vm1, %v1487_v46, 0.0 }
 0x18a   :  { %v2028_v44 = vsel %vm2027_vm2, %v2026_v5, %v2021_v31  ;;  %v4495_v19 = vpop.xlane.xlu1 %1519  ;;  %1831 = vadd.xlane.f32.xlu0 %v1830_v49  ;;  %v1620_v49 = vsel %vm1502_vm1, %v1413_v42, 0.0  ;;  %v3375_v5 = vpop.eup %3374  ;;  %v1425_v38 = vmul.f32 %v4489_v24, %v3373_v52  ;;  %3404 = vtanh.f32 %v4262_v18 }
 0x18b   :  { %v1514_v14 = vpop.xlane.xlu0 %1513  ;;  %v4529_v7 = vsub.s32 %v2064_v25, %v4447_v29  ;;  %v3377_v39 = vpop.eup %3376  ;;  %v1476_v42 = vmul.f32 %v4489_v24, %v3375_v5  ;;  %3406 = vtanh.f32 %v4344_v4 }
 0x18c   :  { %v3379_v34 = vpop.eup %3378  ;;  %v2040_v0 = vrot.slane %v1514_v14, %v4506_v53  ;;  %v1489_v25 = vmul.f32 %v4489_v24, %v3377_v39  ;;  %3408 = vtanh.f32 %v4271_v59 }
 0x18d   :  { %1804 = vadd.xlane.f32.xlu1 %v1803_v11  ;;  %v1812_v11 = vsel %vm1502_vm1, %v1477_v21, 0.0  ;;  %v1415_v52 = vmul.f32 %v4489_v24, %v3379_v34  ;;  %3410 = vtanh.f32 %v4346_v33 }
 0x18e   :  { %v4508_v47 = vpop.xlane.xlu1 %1711  ;;  %1828 = vadd.xlane.f32.xlu0 %v1827_v45 }
 0x18f   :  { %v1706_v61 = vpop.xlane.xlu0 %1705  ;;  %v2391_v51 = vrot.slane %v4508_v47, %v4520_v48  ;;  %v1626_v39 = vsel %vm1502_vm1, %v1415_v52, 0.0 }
 0x190   :  { %v2381_v9 = vrot.slane %v1706_v61, %v4506_v53  ;;  %v2054_v61 = vrot.slane %v4495_v19, %v4520_v48 }
 0x191   :  { %1621 = vadd.xlane.f32.xlu1 %v1620_v49  ;;  %v3381_v49 = vpop.eup %3380  ;;  %3412 = vtanh.f32 %v4353_v8 }
 0x192   :  { %v2382_v31 = vsel %vm2041_vm4, %v2381_v9, %v2377_v22  ;;  %v1517_v57 = vpop.xlane.xlu1 %1516  ;;  %1651 = vadd.xlane.f32.xlu0 %v1650_v32  ;;  %v1656_v32 = vsel %vm1502_vm1, %v1425_v38, 0.0  ;;  %v3383_v21 = vpop.eup %3382  ;;  %v1848_v38 = vsel %vm1502_vm1, %v1489_v25, 0.0  ;;  %3414 = vtanh.f32 %v4277_v58 }
 0x193   :  { %v1511_v41 = vpop.xlane.xlu0 %1510  ;;  %v2047_v45 = vrot.slane %v1517_v57, %v4524_v37  ;;  %v1424_v56 = vmul.f32 %v4489_v24, %v3383_v21 }
 0x194   :  { %v2033_v22 = vrot.slane %v1511_v41, %v4470_v54 }
 0x195   :  { %1813 = vadd.xlane.f32.xlu1 %v1812_v11  ;;  %v1653_v16 = vsel %vm1502_vm1, %v1424_v56, 0.0 }
 0x196   :  { %v2035_v43 = vsel %vm2034_vm3, %v2033_v22, %v2028_v44  ;;  %v1718_v1 = vpop.xlane.xlu1 %1717  ;;  %1843 = vadd.xlane.f32.xlu0 %v1842_v17  ;;  %v1809_v44 = vsel %vm1502_vm1, %v1476_v42, 0.0  ;;  %v3385_v22 = vpop.eup %3384  ;;  %3416 = vtanh.f32 %v4355_v3 }
 0x197   :  { %v2042_v63 = vsel %vm2041_vm4, %v2040_v0, %v2035_v43  ;;  %v1709_v14 = vpop.xlane.xlu0 %1708  ;;  %v2401_v47 = vrot.slane %v1718_v1, %v4529_v7  ;;  %v3387_v42 = vpop.eup %3386  ;;  %v2071_v43 = vadd.s32 4294967232, %v4442_v40  ;;  %3418 = vtanh.f32 %v4281_v13 }
 0x198   :  { %v2386_v46 = vrot.slane %v1709_v14, %v4524_v37  ;;  %v2049_v9 = vsel %vm2048_vm5, %v2047_v45, %v2042_v63  ;;  %v3389_v45 = vpop.eup %3388  ;;  %3420 = vtanh.f32 %v4283_v55 }
 0x199   :  { %1810 = vadd.xlane.f32.xlu1 %v1809_v44  ;;  %v2056_v19 = vsel %vm2055_vm6, %v2054_v61, %v2049_v9  ;;  %v3391_v1 = vpop.eup %3390  ;;  %v2078_v61 = vadd.s32 4294967224, %v4442_v40  ;;  %3422 = vtanh.f32 %v4359_v12 }
 0x19a   :  { %v2387_v5 = vsel %vm2048_vm5, %v2386_v46, %v2382_v31  ;;  %v1715_v57 = vpop.xlane.xlu1 %1714  ;;  %1657 = vadd.xlane.f32.xlu0 %v1656_v32  ;;  %v1479_v31 = vmul.f32 %v4489_v24, %v3381_v49  ;;  %v1414_v32 = vmul.f32 %v4489_v24, %v3385_v22  ;;  %v1488_v46 = vmul.f32 %v4489_v24, %v3387_v42 }
 0x19b   :  { %v2392_v60 = vsel %vm2055_vm6, %v2391_v51, %v2387_v5  ;;  %v2396_v41 = vrot.slane %v1715_v57, %v4542_v15  ;;  %v1526_v17 = vpop.xlane.xlu0 %1525  ;;  %v4586_v49 = vsub.s32 %v2071_v43, %v4447_v29  ;;  %v1491_v51 = vmul.f32 %v4489_v24, %v3391_v1  ;;  %v3393_v57 = vpop.eup %3392 }
 0x19c   :  { %v1818_v14 = vsel %vm1502_vm1, %v1479_v31, 0.0  ;;  %v2068_v25 = vrot.slane %v1526_v17, %v4529_v7  ;;  %v4590_v21 = vsub.s32 %v2078_v61, %v4447_v29  ;;  %v1478_v5 = vmul.f32 %v4489_v24, %v3389_v45  ;;  %v3395_v2 = vpop.eup %3394 }
 0x19d   :  { %v2397_v11 = vsel %vm2062_vm7, %v2396_v41, %v2392_v60  ;;  %1627 = vadd.xlane.f32.xlu1 %v1626_v39  ;;  %v1845_v28 = vsel %vm1502_vm1, %v1488_v46, 0.0  ;;  %v1417_v22 = vmul.f32 %v4489_v24, %v3393_v57  ;;  %v1490_v18 = vmul.f32 %v4489_v24, %v3395_v2 }
 0x19e   :  { %v1532_v34 = vpop.xlane.xlu1 %1531  ;;  %1849 = vadd.xlane.f32.xlu0 %v1848_v38  ;;  %v2402_v0 = vsel %vm2069_vm8, %v2401_v47, %v2397_v11  ;;  %v1854_v38 = vsel %vm1502_vm1, %v1491_v51, 0.0  ;;  %v3397_v47 = vpop.eup %3396  ;;  %v1815_v31 = vsel %vm1502_vm1, %v1478_v5, 0.0 }
 0x19f   :  { %v1523_v23 = vpop.xlane.xlu0 %1522  ;;  %v2082_v39 = vrot.slane %v1532_v34, %v4590_v21  ;;  %v3399_v11 = vpop.eup %3398  ;;  %v1429_v4 = vmul.f32 %v4489_v24, %v3397_v47  ;;  %v1632_v61 = vsel %vm1502_vm1, %v1417_v22, 0.0  ;;  %v1851_v59 = vsel %vm1502_vm1, %v1490_v18, 0.0 }
 0x1a0   :  { %v2061_v63 = vrot.slane %v1523_v23, %v4542_v15  ;;  %v3401_v43 = vpop.eup %3400 }
 0x1a1   :  { %1819 = vadd.xlane.f32.xlu1 %v1818_v14  ;;  %v3403_v14 = vpop.eup %3402  ;;  %v1668_v33 = vsel %vm1502_vm1, %v1429_v4, 0.0 }
 0x1a2   :  { %v2063_v10 = vsel %vm2062_vm7, %v2061_v63, %v2056_v19  ;;  %v1724_v44 = vpop.xlane.xlu1 %1723  ;;  %1654 = vadd.xlane.f32.xlu0 %v1653_v16  ;;  %v1623_v19 = vsel %vm1502_vm1, %v1414_v32, 0.0  ;;  %v1481_v63 = vmul.f32 %v4489_v24, %v3399_v11  ;;  %v1416_v51 = vmul.f32 %v4489_v24, %v3403_v14 }
 0x1a3   :  { %v4582_v52 = vpop.xlane.xlu0 %1741  ;;  %v2070_v9 = vsel %vm2069_vm8, %v2068_v25, %v2063_v10  ;;  %v2411_v1 = vrot.slane %v1724_v44, %v4590_v21  ;;  %v2085_v10 = vadd.s32 4294967216, %v4442_v40  ;;  %v1493_v44 = vmul.f32 %v4489_v24, %v3401_v43 }
 0x1a5   :  { %1624 = vadd.xlane.f32.xlu1 %v1623_v19  ;;  %v3405_v19 = vpop.eup %3404  ;;  %v4634_v57 = vsub.s32 %v2085_v10, %v4447_v29 }
 0x1a6   :  { %v1529_v60 = vpop.xlane.xlu1 %1528  ;;  %1846 = vadd.xlane.f32.xlu0 %v1845_v28  ;;  %v3407_v8 = vpop.eup %3406  ;;  %v1860_v28 = vsel %vm1502_vm1, %v1493_v44, 0.0 }
 0x1a7   :  { %v2075_v41 = vrot.slane %v1529_v60, %v4586_v49  ;;  %v4597_v17 = vpop.xlane.xlu0 %1738  ;;  %v1629_v60 = vsel %vm1502_vm1, %v1416_v51, 0.0  ;;  %v1428_v3 = vmul.f32 %v4489_v24, %v3407_v8 }
 0x1a9   :  { %v2077_v56 = vsel %vm2076_vm9, %v2075_v41, %v2070_v9  ;;  %1816 = vadd.xlane.f32.xlu1 %v1815_v31  ;;  %v1824_v9 = vsel %vm1502_vm1, %v1481_v63, 0.0  ;;  %v1480_v41 = vmul.f32 %v4489_v24, %v3405_v19  ;;  %v1665_v55 = vsel %vm1502_vm1, %v1428_v3, 0.0  ;;  %v5096_v19 = vld [vmem:[#allocation6_spill] sm:$0xff] }
 0x1aa   :  { %v1721_v42 = vpop.xlane.xlu1 %1720  ;;  %1855 = vadd.xlane.f32.xlu0 %v1854_v38  ;;  %v2084_v45 = vsel %vm2083_vm10, %v2082_v39, %v2077_v56  ;;  %v3409_v38 = vpop.eup %3408 }
 0x1ab   :  { %v2406_v34 = vrot.slane %v1721_v42, %v4586_v49  ;;  %v4609_v23 = vpop.xlane.xlu0 %1744  ;;  %v3411_v47 = vpop.eup %3410  ;;  %v1821_v56 = vsel %vm1502_vm1, %v1480_v41, 0.0  ;;  %v1419_v18 = vmul.f32 %v4489_v24, %v3409_v38 }
 0x1ac   :  { %v3413_v22 = vpop.eup %3412  ;;  %v1492_v4 = vmul.f32 %v4489_v24, %v3411_v47 }
 0x1ad   :  { %v2407_v32 = vsel %vm2076_vm9, %v2406_v34, %v2402_v0  ;;  %1633 = vadd.xlane.f32.xlu1 %v1632_v61  ;;  %v2092_v0 = vadd.s32 4294967208, %v4442_v40  ;;  %v3415_v42 = vpop.eup %3414  ;;  %v5094_v61 = vld [vmem:[#allocation5_spill] sm:$0xff]  ;;  %v1431_v14 = vmul.f32 %v4489_v24, %v3413_v22 }
 0x1ae   :  { %v1538_v25 = vpop.xlane.xlu1 %1537  ;;  %1852 = vadd.xlane.f32.xlu0 %v1851_v59  ;;  %v2412_v16 = vsel %vm2083_vm10, %v2411_v1, %v2407_v32  ;;  %3424 = vtanh.f32 %v5094_v61  ;;  %v3417_v32 = vpop.eup %3416  ;;  %v5095_v59 = vld [vmem:[#allocation11_spill] sm:$0xff]  ;;  %v2106_v61 = vadd.s32 4294967192, %v4442_v40 }
 0x1af   :  { %v4621_v46 = vpop.xlane.xlu0 %1567  ;;  %v4638_v2 = vsub.s32 %v2092_v0, %v4447_v29  ;;  %3426 = vtanh.f32 %v5095_v59  ;;  %v3419_v10 = vpop.eup %3418  ;;  %v1857_v0 = vsel %vm1502_vm1, %v1492_v4, 0.0 }
 0x1b0   :  { %3428 = vtanh.f32 %v4367_v30  ;;  %v1421_v41 = vmul.f32 %v4489_v24, %v3419_v10  ;;  %v3421_v38 = vpop.eup %3420  ;;  %v5097_v30 = vld [vmem:[#allocation7_spill] sm:$0xff] }
 0x1b1   :  { %1825 = vadd.xlane.f32.xlu1 %v1824_v9  ;;  %v2096_v11 = vrot.slane %v1538_v25, %v4638_v2  ;;  %v1638_v25 = vsel %vm1502_vm1, %v1419_v18, 0.0  ;;  %3430 = vtanh.f32 %v5096_v19  ;;  %v3423_v3 = vpop.eup %3422  ;;  %v1485_v18 = vmul.f32 %v4489_v24, %v3421_v38  ;;  %v5101_v38 = vld [vmem:[#allocation9_spill] sm:$0xff] }
 0x1b2   :  { %v1730_v5 = vpop.xlane.xlu1 %1729  ;;  %1669 = vadd.xlane.f32.xlu0 %v1668_v33  ;;  %v1418_v33 = vmul.f32 %v4489_v24, %v3415_v42  ;;  %3432 = vtanh.f32 %v5097_v30 }
 0x1b3   :  { %v4631_v58 = vpop.xlane.xlu0 %1759 }
 0x1b5   :  { %1630 = vadd.xlane.f32.xlu1 %v1629_v60  ;;  %v1635_v60 = vsel %vm1502_vm1, %v1418_v33, 0.0  ;;  %v1836_v33 = vsel %vm1502_vm1, %v1485_v18, 0.0 }
 0x1b6   :  { %v1535_v13 = vpop.xlane.xlu1 %1534  ;;  %1861 = vadd.xlane.f32.xlu0 %v1860_v28  ;;  %v2099_v28 = vadd.s32 4294967200, %v4442_v40 }
 0x1b7   :  { %v2089_v39 = vrot.slane %v1535_v13, %v4634_v57  ;;  %v4645_v31 = vpop.xlane.xlu0 %1564 }
 0x1b8   :  { %v3425_v42 = vpop.eup %3424 }
 0x1b9   :  { %v2091_v34 = vsel %vm2090_vm11, %v2089_v39, %v2084_v45  ;;  %1822 = vadd.xlane.f32.xlu1 %v1821_v56  ;;  %v2421_v45 = vrot.slane %v1730_v5, %v4638_v2  ;;  %v1674_v5 = vsel %vm1502_vm1, %v1431_v14, 0.0  ;;  %v4682_v39 = vsub.s32 %v2099_v28, %v4447_v29  ;;  %v5098_v56 = vld [vmem:[#allocation13_spill] sm:$0xff]  ;;  %v3427_v4 = vpop.eup %3426  ;;  %v5099_v14 = vld [vmem:[#allocation14_spill] sm:$0xff] }
 0x1ba   :  { %v1727_v43 = vpop.xlane.xlu1 %1726  ;;  %1666 = vadd.xlane.f32.xlu0 %v1665_v55  ;;  %v2098_v1 = vsel %vm2097_vm12, %v2096_v11, %v2091_v34  ;;  %v1644_v11 = vsel %vm1502_vm1, %v1421_v41, 0.0  ;;  %3434 = vtanh.f32 %v5098_v56  ;;  %v2113_v34 = vadd.s32 4294967184, %v4442_v40 }
 0x1bb   :  { %v2416_v12 = vrot.slane %v1727_v43, %v4634_v57  ;;  %v4657_v63 = vpop.xlane.xlu0 %1756  ;;  %v1430_v55 = vmul.f32 %v4489_v24, %v3423_v3  ;;  %v2120_v43 = vadd.s32 4294967176, %v4442_v40  ;;  %3436 = vtanh.f32 %v5099_v14 }
 0x1bc   :  { %v1420_v10 = vmul.f32 %v4489_v24, %v3425_v42  ;;  %v1494_v28 = vmul.f32 %v4489_v24, %v3427_v4 }
 0x1bd   :  { %v2417_v44 = vsel %vm2090_vm11, %v2416_v12, %v2412_v16  ;;  %1639 = vadd.xlane.f32.xlu1 %v1638_v25  ;;  %v1495_v16 = vmul.f32 %v4489_v24, %v3417_v32  ;;  %v5100_v32 = vld [vmem:[#allocation8_spill] sm:$0xff]  ;;  %v3429_v25 = vpop.eup %3428 }
 0x1be   :  { %v4666_v9 = vpop.xlane.xlu1 %1543  ;;  %1858 = vadd.xlane.f32.xlu0 %v1857_v0  ;;  %v2422_v51 = vsel %vm2097_vm12, %v2421_v45, %v2417_v44  ;;  %3438 = vtanh.f32 %v5100_v32  ;;  %v3431_v44 = vpop.eup %3430  ;;  %v4700_v0 = vsub.s32 %v2113_v34, %v4447_v29  ;;  %v1433_v30 = vmul.f32 %v4489_v24, %v3429_v25 }
 0x1bf   :  { %v4671_v8 = vpop.xlane.xlu0 %1765  ;;  %v1866_v22 = vsel %vm1502_vm1, %v1495_v16, 0.0  ;;  %v4706_v16 = vsub.s32 %v2120_v43, %v4447_v29  ;;  %3440 = vtanh.f32 %v4380_v27  ;;  %v1484_v56 = vmul.f32 %v4489_v24, %v3431_v44  ;;  %v5102_v43 = vld [vmem:[#allocation10_spill] sm:$0xff] }
 0x1c0   :  { %3442 = vtanh.f32 %v5101_v38  ;;  %v2436_v27 = vrot.slane %v4597_v17, %v4700_v0  ;;  %v1863_v42 = vsel %vm1502_vm1, %v1494_v28, 0.0 }
 0x1c1   :  { %1636 = vadd.xlane.f32.xlu1 %v1635_v60  ;;  %v4709_v60 = vsub.s32 %v2106_v61, %v4447_v29  ;;  %v1641_v29 = vsel %vm1502_vm1, %v1420_v10, 0.0  ;;  %3444 = vtanh.f32 %v4382_v6  ;;  %v1833_v32 = vsel %vm1502_vm1, %v1484_v56, 0.0  ;;  %v5103_v10 = vld [vmem:[#allocation12_spill] sm:$0xff] }
 0x1c2   :  { %v1736_v47 = vpop.xlane.xlu1 %1735  ;;  %1675 = vadd.xlane.f32.xlu0 %v1674_v5  ;;  %v1671_v5 = vsel %vm1502_vm1, %v1430_v55, 0.0  ;;  %v2441_v55 = vrot.slane %v4582_v52, %v4706_v16  ;;  %3446 = vtanh.f32 %v5102_v43 }
 0x1c3   :  { %v4679_v13 = vpop.xlane.xlu0 %1762  ;;  %v2110_v25 = vrot.slane %v4666_v9, %v4709_v60  ;;  %3448 = vtanh.f32 %v5103_v10 }
 0x1c5   :  { %1645 = vadd.xlane.f32.xlu1 %v1644_v11  ;;  %v2431_v11 = vrot.slane %v1736_v47, %v4709_v60 }
 0x1c6   :  { %v1541_v12 = vpop.xlane.xlu1 %1540  ;;  %1867 = vadd.xlane.f32.xlu0 %v1866_v22  ;;  %v3433_v22 = vpop.eup %3432 }
 0x1c7   :  { %v2103_v45 = vrot.slane %v1541_v12, %v4682_v39  ;;  %v4695_v59 = vpop.xlane.xlu0 %1579  ;;  %v3435_v34 = vpop.eup %3434  ;;  %v1422_v12 = vmul.f32 %v4489_v24, %v3433_v22 }
 0x1c8   :  { %v3437_v14 = vpop.eup %3436  ;;  %v1432_v6 = vmul.f32 %v4489_v24, %v3435_v34 }
 0x1c9   :  { %v2105_v19 = vsel %vm2104_vm13, %v2103_v45, %v2098_v1  ;;  %1837 = vadd.xlane.f32.xlu1 %v1836_v33  ;;  %v3439_v45 = vpop.eup %3438  ;;  %v1647_v28 = vsel %vm1502_vm1, %v1422_v12, 0.0 }
 0x1ca   :  { %v1733_v41 = vpop.xlane.xlu1 %1732  ;;  %1672 = vadd.xlane.f32.xlu0 %v1671_v5  ;;  %v3441_v38 = vpop.eup %3440  ;;  %v2112_v22 = vsel %vm2111_vm14, %v2110_v25, %v2105_v19  ;;  %v1486_v9 = vmul.f32 %v4489_v24, %v3439_v45  ;;  %v1677_v56 = vsel %vm1502_vm1, %v1432_v6, 0.0 }
 0x1cb   :  { %v2426_v1 = vrot.slane %v1733_v41, %v4682_v39  ;;  %v4714_v3 = vpop.xlane.xlu0 %1771  ;;  %v1496_v41 = vmul.f32 %v4489_v24, %v3437_v14 }
 0x1cd   :  { %v2427_v18 = vsel %vm2104_vm13, %v2426_v1, %v2422_v51  ;;  %1642 = vadd.xlane.f32.xlu1 %v1641_v29  ;;  %v1680_v51 = vsel %vm1502_vm1, %v1433_v30, 0.0  ;;  %v5104_v30 = vld [vmem:[#allocation15_spill] sm:$0xff]  ;;  %v1869_v19 = vsel %vm1502_vm1, %v1496_v41, 0.0 }
 0x1ce   :  { %v2432_v47 = vsel %vm2111_vm14, %v2431_v11, %v2427_v18  ;;  %v1550_v4 = vpop.xlane.xlu1 %1549  ;;  %1864 = vadd.xlane.f32.xlu0 %v1863_v42  ;;  %3450 = vtanh.f32 %v5104_v30  ;;  %v3443_v11 = vpop.eup %3442  ;;  %v5105_v42 = vld [vmem:[#allocation16_spill] sm:$0xff] }
 0x1cf   :  { %v2437_v17 = vsel %vm2118_vm15, %v2436_v27, %v2432_v47  ;;  %v4730_v61 = vpop.xlane.xlu0 %1576  ;;  %v2124_v1 = vrot.slane %v1550_v4, %v4706_v16  ;;  %3452 = vtanh.f32 %v4402_v36  ;;  %v3445_v47 = vpop.eup %3444  ;;  %v1839_v4 = vsel %vm1502_vm1, %v1486_v9, 0.0 }
 0x1d0   :  { %v4736_v52 = vsel %vm2125_vm0, %v2441_v55, %v2437_v17  ;;  %3454 = vtanh.f32 %v5105_v42  ;;  %v1435_v55 = vmul.f32 %v4489_v24, %v3441_v38  ;;  %v1427_v43 = vmul.f32 %v4489_v24, %v3443_v11  ;;  %v3447_v17 = vpop.eup %3446 }
 0x1d1   :  { %1834 = vadd.xlane.f32.xlu1 %v1833_v32  ;;  %3456 = vtanh.f32 %v4396_v26  ;;  %v2446_v36 = vrot.slane %v4609_v23, %v4459_v62  ;;  %v1499_v45 = vmul.f32 %v4489_v24, %v3445_v47  ;;  %v1426_v25 = vmul.f32 %v4489_v24, %v3447_v17  ;;  %v3449_v26 = vpop.eup %3448 }
 0x1d2   :  { %v1547_v33 = vpop.xlane.xlu1 %1546  ;;  %1681 = vadd.xlane.f32.xlu0 %v1680_v51  ;;  %3458 = vtanh.f32 %v4404_v35  ;;  %v1686_v32 = vsel %vm1502_vm1, %v1435_v55, 0.0  ;;  %v1662_v6 = vsel %vm1502_vm1, %v1427_v43, 0.0  ;;  %v1497_v30 = vmul.f32 %v4489_v24, %v3449_v26 }
 0x1d3   :  { %v2117_v44 = vrot.slane %v1547_v33, %v4700_v0  ;;  %v4743_v5 = vpop.xlane.xlu0 %1768  ;;  %3460 = vtanh.f32 %v4398_v20  ;;  %v1878_v41 = vsel %vm1502_vm1, %v1499_v45, 0.0 }
 0x1d5   :  { %v2119_v29 = vsel %vm2118_vm15, %v2117_v44, %v2112_v22  ;;  %1648 = vadd.xlane.f32.xlu1 %v1647_v28 }
 0x1d6   :  { %v4754_v27 = vsel %vm2125_vm0, %v2124_v1, %v2119_v29  ;;  %v1556_v18 = vpop.xlane.xlu1 %1555  ;;  %1678 = vadd.xlane.f32.xlu0 %v1677_v56  ;;  %v1659_v1 = vsel %vm1502_vm1, %v1426_v25, 0.0 }
 0x1d7   :  { %v4758_v34 = vpop.xlane.xlu0 %1585  ;;  %v2134_v23 = vrot.slane %v1556_v18, %v4465_v50 }
 0x1d8   :  { %v3451_v35 = vpop.eup %3450 }
 0x1d9   :  { %1840 = vadd.xlane.f32.xlu1 %v1839_v4  ;;  %v3453_v38 = vpop.eup %3452  ;;  %v1434_v11 = vmul.f32 %v4489_v24, %v3451_v35 }
 0x1da   :  { %v1748_v51 = vpop.xlane.xlu1 %1747  ;;  %1870 = vadd.xlane.f32.xlu0 %v1869_v19  ;;  %v3455_v22 = vpop.eup %3454  ;;  %v1436_v20 = vmul.f32 %v4489_v24, %v3453_v38  ;;  %v1872_v19 = vsel %vm1502_vm1, %v1497_v30, 0.0  ;;  %v2154_v38 = vrot.slane %v4621_v46, %v4520_v48 }
 0x1db   :  { %v2450_v12 = vrot.slane %v1748_v51, %v4465_v50  ;;  %v4769_v14 = vpop.xlane.xlu0 %1777  ;;  %v3457_v56 = vpop.eup %3456  ;;  %v1498_v55 = vmul.f32 %v4489_v24, %v3455_v22  ;;  %v1683_v47 = vsel %vm1502_vm1, %v1434_v11, 0.0 }
 0x1dc   :  { %v3459_v42 = vpop.eup %3458  ;;  %v1689_v17 = vsel %vm1502_vm1, %v1436_v20, 0.0  ;;  %v2470_v20 = vrot.slane %v4631_v58, %v4520_v48  ;;  %v2490_v58 = vrot.slane %v4714_v3, %v4590_v21  ;;  %v2169_v3 = vrot.slane %v4730_v61, %v4586_v49 }
 0x1dd   :  { %v2451_v33 = vsel %vm2027_vm2, %v2450_v12, %v2446_v36  ;;  %1663 = vadd.xlane.f32.xlu1 %v1662_v6  ;;  %v1500_v51 = vmul.f32 %v4489_v24, %v3459_v42  ;;  %v1875_v36 = vsel %vm1502_vm1, %v1498_v55, 0.0  ;;  %v1437_v12 = vmul.f32 %v4489_v24, %v3457_v56 }
 0x1de   :  { %v1553_v10 = vpop.xlane.xlu1 %1552  ;;  %1687 = vadd.xlane.f32.xlu0 %v1686_v32  ;;  %v3461_v32 = vpop.eup %3460  ;;  %v2475_v55 = vrot.slane %v4679_v13, %v4542_v15 }
 0x1df   :  { %v2130_v44 = vrot.slane %v1553_v10, %v4459_v62  ;;  %v4779_v28 = vpop.xlane.xlu0 %1582  ;;  %v1881_v26 = vsel %vm1502_vm1, %v1500_v51, 0.0  ;;  %v1692_v10 = vsel %vm1502_vm1, %v1437_v12, 0.0 }
 0x1e1   :  { %v2135_v9 = vsel %vm2027_vm2, %v2134_v23, %v2130_v44  ;;  %1660 = vadd.xlane.f32.xlu1 %v1659_v1  ;;  %v1501_v23 = vmul.f32 %v4489_v24, %v3461_v32  ;;  %v2149_v44 = vrot.slane %v4645_v31, %v4524_v37 }
 0x1e2   :  { %v1562_v29 = vpop.xlane.xlu1 %1561  ;;  %1879 = vadd.xlane.f32.xlu0 %v1878_v41 }
 0x1e3   :  { %v4786_v18 = vpop.xlane.xlu0 %1774  ;;  %v2144_v35 = vrot.slane %v1562_v29, %v4506_v53  ;;  %v1884_v56 = vsel %vm1502_vm1, %v1501_v23, 0.0  ;;  %v2174_v23 = vrot.slane %v4695_v59, %v4590_v21  ;;  %vm2680_vm1 = vcmask 1041409  }
 0x1e4   :  { %v2495_v13 = vrot.slane %v4786_v18, %v4634_v57 }
 0x1e5   :  { %1873 = vadd.xlane.f32.xlu1 %v1872_v19 }
 0x1e6   :  { %v1754_v4 = vpop.xlane.xlu1 %1753  ;;  %1684 = vadd.xlane.f32.xlu0 %v1683_v47 }
 0x1e7   :  { %v4792_v43 = vpop.xlane.xlu0 %1591  ;;  %v2460_v24 = vrot.slane %v1754_v4, %v4506_v53 }
 0x1e9   :  { %1876 = vadd.xlane.f32.xlu1 %v1875_v36 }
 0x1ea   :  { %v1559_v45 = vpop.xlane.xlu1 %1558  ;;  %1690 = vadd.xlane.f32.xlu0 %v1689_v17  ;;  %v2480_v17 = vrot.slane %v4671_v8, %v4529_v7 }
 0x1eb   :  { %v2139_v6 = vrot.slane %v1559_v45, %v4470_v54  ;;  %v4799_v25 = vpop.xlane.xlu0 %1588 }
 0x1ed   :  { %v2140_v41 = vsel %vm2034_vm3, %v2139_v6, %v2135_v9  ;;  %1693 = vadd.xlane.f32.xlu1 %v1692_v10  ;;  %v2465_v9 = vrot.slane %v4657_v63, %v4524_v37  ;;  %v2500_v6 = vrot.slane %v4769_v14, %v4638_v2 }
 0x1ee   :  { %v2145_v1 = vsel %vm2041_vm4, %v2144_v35, %v2140_v41  ;;  %v1751_v30 = vpop.xlane.xlu1 %1750  ;;  %1882 = vadd.xlane.f32.xlu0 %v1881_v26 }
 0x1ef   :  { %v2455_v22 = vrot.slane %v1751_v30, %v4470_v54  ;;  %v1781_v11 = vpop.xlane.xlu0 %1780  ;;  %v2150_v29 = vsel %vm2048_vm5, %v2149_v44, %v2145_v1 }
 0x1f0   :  { %v2155_v31 = vsel %vm2055_vm6, %v2154_v38, %v2150_v29  ;;  %v2505_v10 = vrot.slane %v1781_v11, %v4682_v39  ;;  %v2179_v38 = vrot.slane %v4779_v28, %v4634_v57  ;;  %v2184_v11 = vrot.slane %v4758_v34, %v4638_v2 }
 0x1f1   :  { %v2456_v46 = vsel %vm2034_vm3, %v2455_v22, %v2451_v33  ;;  %1885 = vadd.xlane.f32.xlu1 %v1884_v56  ;;  %v2485_v33 = vrot.slane %v4743_v5, %v4586_v49  ;;  %v2189_v29 = vrot.slane %v4799_v25, %v4682_v39 }
 0x1f2   :  { %v2461_v42 = vsel %vm2041_vm4, %v2460_v24, %v2456_v46  ;;  %v1574_v19 = vpop.xlane.xlu1 %1573 }
 0x1f3   :  { %v2466_v47 = vsel %vm2048_vm5, %v2465_v9, %v2461_v42  ;;  %v1598_v4 = vpop.xlane.xlu0 %1597  ;;  %v2164_v26 = vrot.slane %v1574_v19, %v4529_v7 }
 0x1f4   :  { %v2471_v63 = vsel %vm2055_vm6, %v2470_v20, %v2466_v47  ;;  %v2204_v19 = vrot.slane %v1598_v4, %v4706_v16 }
 0x1f5   :  { %v2476_v51 = vsel %vm2062_vm7, %v2475_v55, %v2471_v63 }
 0x1f6   :  { %v2481_v36 = vsel %vm2069_vm8, %v2480_v17, %v2476_v51  ;;  %v1571_v12 = vpop.xlane.xlu1 %1570 }
 0x1f7   :  { %v2486_v32 = vsel %vm2076_vm9, %v2485_v33, %v2481_v36  ;;  %v2159_v8 = vrot.slane %v1571_v12, %v4542_v15  ;;  %v1790_v45 = vpop.xlane.xlu0 %1789 }
 0x1f8   :  { %v2491_v5 = vsel %vm2083_vm10, %v2490_v58, %v2486_v32  ;;  %v2520_v25 = vrot.slane %v1790_v45, %v4706_v16 }
 0x1f9   :  { %v2496_v35 = vsel %vm2090_vm11, %v2495_v13, %v2491_v5  ;;  %v2160_v18 = vsel %vm2062_vm7, %v2159_v8, %v2155_v31  ;;  %v2194_v31 = vrot.slane %v4792_v43, %v4709_v60 }
 0x1fa   :  { %v2501_v44 = vsel %vm2097_vm12, %v2500_v6, %v2496_v35  ;;  %v2165_v14 = vsel %vm2069_vm8, %v2164_v26, %v2160_v18  ;;  %v1784_v41 = vpop.xlane.xlu1 %1783 }
 0x1fb   :  { %v2506_v1 = vsel %vm2104_vm13, %v2505_v10, %v2501_v44  ;;  %v2170_v61 = vsel %vm2076_vm9, %v2169_v3, %v2165_v14  ;;  %v2510_v30 = vrot.slane %v1784_v41, %v4709_v60  ;;  %v1595_v22 = vpop.xlane.xlu0 %1594 }
 0x1fc   :  { %v2175_v59 = vsel %vm2083_vm10, %v2174_v23, %v2170_v61  ;;  %v2199_v28 = vrot.slane %v1595_v22, %v4700_v0 }
 0x1fd   :  { %v2511_v24 = vsel %vm2111_vm14, %v2510_v30, %v2506_v1  ;;  %v2180_v56 = vsel %vm2090_vm11, %v2179_v38, %v2175_v59 }
 0x1fe   :  { %v2185_v9 = vsel %vm2097_vm12, %v2184_v11, %v2180_v56  ;;  %v1787_v46 = vpop.xlane.xlu1 %1786 }
 0x1ff   :  { %v2190_v20 = vsel %vm2104_vm13, %v2189_v29, %v2185_v9  ;;  %v2515_v34 = vrot.slane %v1787_v46, %v4700_v0  ;;  %v1601_v42 = vpop.xlane.xlu0 %1600 }
 0x200   :  { %v2195_v55 = vsel %vm2111_vm14, %v2194_v31, %v2190_v20  ;;  %v2209_v43 = vrot.slane %v1601_v42, %v4459_v62 }
 0x201   :  { %v2200_v47 = vsel %vm2118_vm15, %v2199_v28, %v2195_v55  ;;  %v2516_v17 = vsel %vm2118_vm15, %v2515_v34, %v2511_v24 }
 0x202   :  { %v2205_v63 = vsel %vm2125_vm0, %v2204_v19, %v2200_v47  ;;  %v4877_v33 = vsel %vm2125_vm0, %v2520_v25, %v2516_v17  ;;  %v1604_v51 = vpop.xlane.xlu1 %1603 }
 0x203   :  { %v4880_v58 = vsel %vm2680_vm1, %v2205_v63, %v4754_v27  ;;  %v2213_v4 = vrot.slane %v1604_v51, %v4465_v50  ;;  %v1793_v36 = vpop.xlane.xlu0 %1792  ;;  %vm2682_vm1 = vcmask 1042434  }
 0x204   :  { %v2525_v13 = vrot.slane %v1793_v36, %v4459_v62 }
 0x205   :  { %v2214_v12 = vsel %vm2027_vm2, %v2213_v4, %v2209_v43 }
 0x206   :  { %v1796_v32 = vpop.xlane.xlu1 %1795 }
 0x207   :  { %v2529_v8 = vrot.slane %v1796_v32, %v4465_v50  ;;  %v1607_v45 = vpop.xlane.xlu0 %1606 }
 0x208   :  { %v2218_v6 = vrot.slane %v1607_v45, %v4470_v54 }
 0x209   :  { %v2530_v5 = vsel %vm2027_vm2, %v2529_v8, %v2525_v13 }
 0x20a   :  { %v2219_v26 = vsel %vm2034_vm3, %v2218_v6, %v2214_v12  ;;  %v1610_v3 = vpop.xlane.xlu1 %1609 }
 0x20b   :  { %v2223_v27 = vrot.slane %v1610_v3, %v4506_v53  ;;  %v1799_v35 = vpop.xlane.xlu0 %1798 }
 0x20c   :  { %v2534_v10 = vrot.slane %v1799_v35, %v4470_v54 }
 0x20d   :  { %v2224_v18 = vsel %vm2041_vm4, %v2223_v27, %v2219_v26 }
 0x20e   :  { %v2535_v23 = vsel %vm2034_vm3, %v2534_v10, %v2530_v5  ;;  %v1802_v44 = vpop.xlane.xlu1 %1801 }
 0x20f   :  { %v2539_v14 = vrot.slane %v1802_v44, %v4506_v53  ;;  %v1616_v41 = vpop.xlane.xlu0 %1615 }
 0x210   :  { %v2233_v59 = vrot.slane %v1616_v41, %v4520_v48 }
 0x211   :  { %v2540_v38 = vsel %vm2041_vm4, %v2539_v14, %v2535_v23 }
 0x212   :  { %v1808_v1 = vpop.xlane.xlu1 %1807 }
 0x213   :  { %v1619_v61 = vpop.xlane.xlu0 %1618  ;;  %v2549_v20 = vrot.slane %v1808_v1, %v4520_v48 }
 0x214   :  { %v2238_v29 = vrot.slane %v1619_v61, %v4542_v15 }
 0x216   :  { %v1613_v30 = vpop.xlane.xlu1 %1612 }
 0x217   :  { %v2228_v22 = vrot.slane %v1613_v30, %v4524_v37  ;;  %v1832_v11 = vpop.xlane.xlu0 %1831 }
 0x219   :  { %v2229_v24 = vsel %vm2048_vm5, %v2228_v22, %v2224_v18 }
 0x21a   :  { %v2234_v56 = vsel %vm2055_vm6, %v2233_v59, %v2229_v24  ;;  %v1805_v28 = vpop.xlane.xlu1 %1804 }
 0x21b   :  { %v2544_v31 = vrot.slane %v1805_v28, %v4524_v37  ;;  %v1829_v9 = vpop.xlane.xlu0 %1828  ;;  %v2239_v46 = vsel %vm2062_vm7, %v2238_v29, %v2234_v56 }
 0x21d   :  { %v2545_v34 = vsel %vm2048_vm5, %v2544_v31, %v2540_v38 }
 0x21e   :  { %v1622_v42 = vpop.xlane.xlu1 %1621  ;;  %v2550_v19 = vsel %vm2055_vm6, %v2549_v20, %v2545_v34  ;;  %v2589_v34 = vrot.slane %v1832_v11, %v4709_v60 }
 0x21f   :  { %v2243_v25 = vrot.slane %v1622_v42, %v4529_v7  ;;  %v4906_v55 = vpop.xlane.xlu0 %1651 }
 0x221   :  { %v2244_v47 = vsel %vm2069_vm8, %v2243_v25, %v2239_v46  ;;  %v2584_v46 = vrot.slane %v1829_v9, %v4682_v39 }
 0x222   :  { %v1814_v17 = vpop.xlane.xlu1 %1813 }
 0x223   :  { %v4909_v43 = vpop.xlane.xlu0 %1843  ;;  %v2559_v36 = vrot.slane %v1814_v17, %v4529_v7 }
 0x226   :  { %v1811_v63 = vpop.xlane.xlu1 %1810 }
 0x227   :  { %v2554_v51 = vrot.slane %v1811_v63, %v4542_v15  ;;  %v4912_v4 = vpop.xlane.xlu0 %1657 }
 0x229   :  { %v2555_v12 = vsel %vm2062_vm7, %v2554_v51, %v2550_v19 }
 0x22a   :  { %v1628_v13 = vpop.xlane.xlu1 %1627  ;;  %v2560_v32 = vsel %vm2069_vm8, %v2559_v36, %v2555_v12 }
 0x22b   :  { %v4917_v8 = vpop.xlane.xlu0 %1849  ;;  %v2253_v27 = vrot.slane %v1628_v13, %v4590_v21 }
 0x22e   :  { %v1820_v45 = vpop.xlane.xlu1 %1819 }
 0x22f   :  { %v4919_v6 = vpop.xlane.xlu0 %1654  ;;  %v2569_v14 = vrot.slane %v1820_v45, %v4590_v21 }
 0x232   :  { %v1625_v5 = vpop.xlane.xlu1 %1624 }
 0x233   :  { %v2248_v26 = vrot.slane %v1625_v5, %v4586_v49  ;;  %v4922_v3 = vpop.xlane.xlu0 %1846 }
 0x235   :  { %v2249_v35 = vsel %vm2076_vm9, %v2248_v26, %v2244_v47 }
 0x236   :  { %v1817_v10 = vpop.xlane.xlu1 %1816  ;;  %v2254_v18 = vsel %vm2083_vm10, %v2253_v27, %v2249_v35 }
 0x237   :  { %v2564_v23 = vrot.slane %v1817_v10, %v4586_v49  ;;  %v4928_v44 = vpop.xlane.xlu0 %1855 }
 0x239   :  { %v2565_v41 = vsel %vm2076_vm9, %v2564_v23, %v2560_v32 }
 0x23a   :  { %v1634_v38 = vpop.xlane.xlu1 %1633  ;;  %v2570_v1 = vsel %vm2083_vm10, %v2569_v14, %v2565_v41 }
 0x23b   :  { %v4933_v61 = vpop.xlane.xlu0 %1852  ;;  %v2263_v32 = vrot.slane %v1634_v38, %v4638_v2 }
 0x23e   :  { %v1826_v30 = vpop.xlane.xlu1 %1825 }
 0x23f   :  { %v4935_v22 = vpop.xlane.xlu0 %1669  ;;  %v2579_v31 = vrot.slane %v1826_v30, %v4638_v2 }
 0x242   :  { %v1631_v59 = vpop.xlane.xlu1 %1630 }
 0x243   :  { %v4937_v29 = vpop.xlane.xlu0 %1861  ;;  %v2258_v36 = vrot.slane %v1631_v59, %v4634_v57 }
 0x245   :  { %v2259_v13 = vsel %vm2090_vm11, %v2258_v36, %v2254_v18 }
 0x246   :  { %v1823_v24 = vpop.xlane.xlu1 %1822  ;;  %v2264_v26 = vsel %vm2097_vm12, %v2263_v32, %v2259_v13  ;;  %v2613_v13 = vrot.slane %v4922_v3, %v4470_v54 }
 0x247   :  { %v2574_v56 = vrot.slane %v1823_v24, %v4634_v57  ;;  %v4940_v28 = vpop.xlane.xlu0 %1666 }
 0x249   :  { %v2575_v20 = vsel %vm2090_vm11, %v2574_v56, %v2570_v1 }
 0x24a   :  { %v2580_v42 = vsel %vm2097_vm12, %v2579_v31, %v2575_v20  ;;  %v1640_v19 = vpop.xlane.xlu1 %1639  ;;  %v2292_v31 = vrot.slane %v4906_v55, %v4465_v50 }
 0x24b   :  { %v1859_v25 = vpop.xlane.xlu0 %1858  ;;  %v2585_v47 = vsel %vm2104_vm13, %v2584_v46, %v2580_v42  ;;  %v2273_v35 = vrot.slane %v1640_v19, %v4709_v60  ;;  %v2302_v42 = vrot.slane %v4912_v4, %v4506_v53 }
 0x24c   :  { %v4949_v17 = vsel %vm2111_vm14, %v2589_v34, %v2585_v47  ;;  %v2297_v34 = vrot.slane %v4919_v6, %v4470_v54  ;;  %v2618_v6 = vrot.slane %v4917_v8, %v4506_v53  ;;  %v2638_v53 = vrot.slane %v4937_v29, %v4529_v7 }
 0x24d   :  { %v2322_v29 = vrot.slane %v4935_v22, %v4529_v7 }
 0x24e   :  { %v1637_v63 = vpop.xlane.xlu1 %1636 }
 0x24f   :  { %v4951_v51 = vpop.xlane.xlu0 %1675  ;;  %v2268_v11 = vrot.slane %v1637_v63, %v4682_v39 }
 0x251   :  { %v2269_v27 = vsel %vm2104_vm13, %v2268_v11, %v2264_v26  ;;  %v2623_v11 = vrot.slane %v4933_v61, %v4524_v37 }
 0x252   :  { %v1646_v12 = vpop.xlane.xlu1 %1645  ;;  %v2274_v41 = vsel %vm2111_vm14, %v2273_v35, %v2269_v27  ;;  %v2633_v27 = vrot.slane %v1859_v25, %v4542_v15  ;;  %v2317_v25 = vrot.slane %v4940_v28, %v4542_v15  ;;  %v2332_v15 = vrot.slane %v4951_v51, %v4590_v21 }
 0x253   :  { %v4954_v9 = vpop.xlane.xlu0 %1867  ;;  %v2283_v18 = vrot.slane %v1646_v12, %v4706_v16 }
 0x256   :  { %v4959_v45 = vpop.xlane.xlu1 %1837 }
 0x257   :  { %v4961_v5 = vpop.xlane.xlu0 %1672 }
 0x25a   :  { %v1643_v10 = vpop.xlane.xlu1 %1642 }
 0x25b   :  { %v2278_v23 = vrot.slane %v1643_v10, %v4700_v0  ;;  %v1865_v14 = vpop.xlane.xlu0 %1864 }
 0x25d   :  { %v2279_v38 = vsel %vm2118_vm15, %v2278_v23, %v2274_v41  ;;  %v2643_v23 = vrot.slane %v1865_v14, %v4586_v49  ;;  %v2327_v14 = vrot.slane %v4961_v5, %v4586_v49 }
 0x25e   :  { %v2284_v1 = vsel %vm2125_vm0, %v2283_v18, %v2279_v38  ;;  %v4971_v30 = vpop.xlane.xlu1 %1834 }
 0x25f   :  { %v4973_v59 = vpop.xlane.xlu0 %1681  ;;  %v4976_v24 = vsel %vm2682_vm1, %v2284_v1, %v4880_v58  ;;  %v2608_v58 = vrot.slane %v4909_v43, %v4465_v50 }
 0x260   :  { %v2342_v49 = vrot.slane %v4973_v59, %v4638_v2 }
 0x262   :  { %v1649_v56 = vpop.xlane.xlu1 %1648 }
 0x263   :  { %v2288_v46 = vrot.slane %v1649_v56, %v4459_v62  ;;  %v1679_v20 = vpop.xlane.xlu0 %1678 }
 0x264   :  { %v2337_v28 = vrot.slane %v1679_v20, %v4634_v57 }
 0x265   :  { %v2293_v19 = vsel %vm2027_vm2, %v2292_v31, %v2288_v46 }
 0x266   :  { %v2298_v47 = vsel %vm2034_vm3, %v2297_v34, %v2293_v19  ;;  %v1841_v63 = vpop.xlane.xlu1 %1840 }
 0x267   :  { %v2604_v36 = vrot.slane %v1841_v63, %v4459_v62  ;;  %v1871_v55 = vpop.xlane.xlu0 %1870  ;;  %v2303_v12 = vsel %vm2041_vm4, %v2302_v42, %v2298_v47  ;;  %v2628_v62 = vrot.slane %v4928_v44, %v4520_v48 }
 0x268   :  { %v2653_v5 = vrot.slane %v1871_v55, %v4634_v57 }
 0x269   :  { %v2609_v4 = vsel %vm2027_vm2, %v2608_v58, %v2604_v36  ;;  %vm2684_vm2 = vcmask 1043459  }
 0x26a   :  { %v2614_v32 = vsel %vm2034_vm3, %v2613_v13, %v2609_v4  ;;  %v1664_v26 = vpop.xlane.xlu1 %1663  ;;  %vm2686_vm3 = vcmask 1044484  }
 0x26b   :  { %v2619_v50 = vsel %vm2041_vm4, %v2618_v6, %v2614_v32  ;;  %v1688_v43 = vpop.xlane.xlu0 %1687  ;;  %v2312_v18 = vrot.slane %v1664_v26, %v4520_v48  ;;  %vm2688_vm4 = vcmask 1045509  }
 0x26c   :  { %v2624_v54 = vsel %vm2048_vm5, %v2623_v11, %v2619_v50  ;;  %v2352_v63 = vrot.slane %v1688_v43, %v4709_v60 }
 0x26d   :  { %v2629_v8 = vsel %vm2055_vm6, %v2628_v62, %v2624_v54 }
 0x26e   :  { %v2634_v3 = vsel %vm2062_vm7, %v2633_v27, %v2629_v8  ;;  %v1661_v61 = vpop.xlane.xlu1 %1660 }
 0x26f   :  { %v2639_v35 = vsel %vm2069_vm8, %v2638_v53, %v2634_v3  ;;  %v2307_v10 = vrot.slane %v1661_v61, %v4524_v37  ;;  %v1880_v44 = vpop.xlane.xlu0 %1879  ;;  %v2648_v37 = vrot.slane %v4954_v9, %v4590_v21 }
 0x270   :  { %v2644_v38 = vsel %vm2076_vm9, %v2643_v23, %v2639_v35  ;;  %v2668_v13 = vrot.slane %v1880_v44, %v4709_v60  ;;  %v2599_v60 = vrot.slane %v4959_v45, %v4706_v16 }
 0x271   :  { %v2308_v41 = vsel %vm2048_vm5, %v2307_v10, %v2303_v12  ;;  %v2649_v22 = vsel %vm2083_vm10, %v2648_v37, %v2644_v38  ;;  %vm2690_vm5 = vcmask 1046534  }
 0x272   :  { %v2313_v1 = vsel %vm2055_vm6, %v2312_v18, %v2308_v41  ;;  %v1874_v56 = vpop.xlane.xlu1 %1873  ;;  %v2654_v47 = vsel %vm2090_vm11, %v2653_v5, %v2649_v22  ;;  %vm2692_vm6 = vcmask 1047559  }
 0x273   :  { %v2318_v48 = vsel %vm2062_vm7, %v2317_v25, %v2313_v1  ;;  %v1685_v31 = vpop.xlane.xlu0 %1684  ;;  %v2658_v46 = vrot.slane %v1874_v56, %v4638_v2  ;;  %v2594_v2 = vrot.slane %v4971_v30, %v4700_v0  ;;  %vm1889_vm7 = vcmp.lt.s32.totalorder %v4442_v40, 8 }
 0x274   :  { %v2323_v7 = vsel %vm2069_vm8, %v2322_v29, %v2318_v48  ;;  %v2347_v9 = vrot.slane %v1685_v31, %v4682_v39 }
 0x275   :  { %v2328_v34 = vsel %vm2076_vm9, %v2327_v14, %v2323_v7  ;;  %v2659_v57 = vsel %vm2097_vm12, %v2658_v46, %v2654_v47  ;;  %v2595_v30 = vsel %vm2118_vm15, %v2594_v2, %v4949_v17 }
 0x276   :  { %v2333_v42 = vsel %vm2083_vm10, %v2332_v15, %v2328_v34  ;;  %v1877_v21 = vpop.xlane.xlu1 %1876  ;;  %v2600_v17 = vsel %vm2125_vm0, %v2599_v60, %v2595_v30 }
 0x277   :  { %v2338_v51 = vsel %vm2090_vm11, %v2337_v28, %v2333_v42  ;;  %v2663_v20 = vrot.slane %v1877_v21, %v4682_v39  ;;  %v1691_v19 = vpop.xlane.xlu0 %1690 }
 0x278   :  { %v2343_v58 = vsel %vm2097_vm12, %v2342_v49, %v2338_v51  ;;  %v2357_v36 = vrot.slane %v1691_v19, %v4700_v0 }
 0x279   :  { %v2348_v59 = vsel %vm2104_vm13, %v2347_v9, %v2343_v58  ;;  %v2664_v55 = vsel %vm2104_vm13, %v2663_v20, %v2659_v57 }
 0x27a   :  { %v2353_v39 = vsel %vm2111_vm14, %v2352_v63, %v2348_v59  ;;  %v1694_v12 = vpop.xlane.xlu1 %1693  ;;  %v2669_v62 = vsel %vm2111_vm14, %v2668_v13, %v2664_v55 }
 0x27b   :  { %v2358_v6 = vsel %vm2118_vm15, %v2357_v36, %v2353_v39  ;;  %v2362_v4 = vrot.slane %v1694_v12, %v4706_v16  ;;  %v1883_v11 = vpop.xlane.xlu0 %1882 }
 0x27c   :  { %v2673_v32 = vrot.slane %v1883_v11, %v4700_v0 }
 0x27d   :  { %v2363_v26 = vsel %vm2125_vm0, %v2362_v4, %v2358_v6 }
 0x27e   :  { %v2685_v50 = vsel %vm2684_vm2, %v2363_v26, %v4976_v24  ;;  %v2674_v43 = vsel %vm2118_vm15, %v2673_v32, %v2669_v62  ;;  %v1886_v27 = vpop.xlane.xlu1 %1885 }
 0x27f   :  { %v2678_v0 = vrot.slane %v1886_v27, %v4706_v16  ;;  %v2687_v54 = vsel %vm2686_vm3, %v4736_v52, %v2685_v50 }
 0x280   :  { %v2689_v53 = vsel %vm2688_vm4, %v4877_v33, %v2687_v54 }
 0x281   :  { %v2679_v8 = vsel %vm2125_vm0, %v2678_v0, %v2674_v43  ;;  %v2691_v45 = vsel %vm2690_vm5, %v2600_v17, %v2689_v53 }
 0x282   :  { %v2693_v3 = vsel %vm2692_vm6, %v2679_v8, %v2691_v45 }
 0x283   :  { %v2695_v24 = vsel %vm1889_vm7, %v2693_v3, -1e+30 }
 0x284   :  { %2696 = vmax.xlane.f32.xlu0 %v2695_v24 }
 0x311   :  { %v2697_v61 = vpop.xlane.xlu0 %2696 }
 0x312   :  { %v2698_v35 = vsub.f32 %v2695_v24, %v2697_v61 }
 0x314   :  { %v2699_v10 = vmul.f32 1.442695, %v2698_v35 }
 0x316   :  { %3462 = vpow2.f32 %v2699_v10 }
 0x320   :  { %v3463_v16 = vpop.eup %3462 }
 0x321   :  { %2701 = vadd.xlane.f32.xlu1 %v3463_v16 }
 0x3ae   :  { %v2702_v52 = vpop.xlane.xlu1 %2701 }
 0x3af   :  { %3464 = vrcp.f32 %v2702_v52 }
 0x3b9   :  { %v3465_v40 = vpop.eup %3464 }
 0x3ba   :  { %v2704_v44 = vmul.f32 %v3465_v40, %v3463_v16 }
 0x3bc   :  { %2705 = vst [vmem:[#allocation2] sm:$0xff] %v2704_v44 }
 0x3bd   :  { %3478 = shalt.err (!%p3475_p4)
}
 0x3be   :  { %s3479_s7 = scalar_lea.hbm %s5081_s3, 128 }
 0x3bf   :  { %p3480_p5 = scmp.ne.s32.totalorder %s5081_s3, %s3479_s7  ;;  %p3483_p6 = scmp.lt.u32.totalorder %s3479_s7, %s5081_s3 }
 0x3c1   :  { %p3485_p7 = pnand %p3483_p6, %p3480_p5 }
 0x3c3   :  { %3488 = shalt.err (!%p3485_p7)
}
 0x3c4   :  { %2715 = dma.vmem_to_hbm [thread:$0]  %s2713_s30, 128, %s5081_s3, [#allocation3]  }
 0x3c5   :  { %3489 = dma.done.wait [#allocation3], 128  }
 0x3c6   :  { %3490 = vsyncadd [#allocation3], 4294967168 }
 0x3c7   :  { %2719 = vsyncpa [#allocation3], 1 }

</bundles_post_ra>
